<compile_context>
chip_gen: v6e
topology: v6e:2x2x1
jax: 0.10.0
libtpu: 0.0.40
codegen_flags: <defaults>
</compile_context>

<pallas_src>
import functools

import jax
import jax.numpy as jnp
from jax import lax
from jax.experimental import pallas as pl
from jax.experimental.pallas import tpu as pltpu


# --------------------------------------------------------------------------
# Kernel
# --------------------------------------------------------------------------
def _sa_kernel(x_ref, t_ref, o_ref, sum_ref, max_ref, *,
               C, C_BLK, NB, K, P, D, HW, mask_c, ch_sub):
    # x_ref   : (NB, C_BLK, D, HW)   VMEM   channel-chunk of NB batch elements
    # t_ref   : (2*K*HW, HW) bf16    VMEM   Toeplitz conv weights (resident)
    # o_ref   : (NB, D, HW)          VMEM   output block (resident across C)
    # sum_ref : (NB, D, HW) f32      VMEM   running channel sum
    # max_ref : (NB, D, HW) f32      VMEM   running channel max
    c = pl.program_id(1)
    nc = (C + C_BLK - 1) // C_BLK          # static
    last_block_base = (nc - 1) * C_BLK     # static

    # ---- streaming channel reduction (sub-chunked: the full C block is never
    # ---- materialized in vregs, keeping the phase vld/VALU-bound) ----
    psum = None
    pmax = None
    for j0 in range(0, C_BLK, ch_sub):
        sub = min(ch_sub, C_BLK - j0)
        xc = x_ref[:, j0:j0 + sub, :, :].astype(jnp.float32)   # (NB, sub, D, HW)
        if mask_c and (last_block_base + j0 + sub > C):
            # Only sub-chunks that can spill past C are masked; for every
            # non-final grid block this predicate is all-true anyway.
            ch = (c * C_BLK + j0
                  + lax.broadcasted_iota(jnp.int32, (1, sub, 1, 1), 1))
            valid = ch < C
            s = jnp.sum(jnp.where(valid, xc, 0.0), axis=1)
            m = jnp.max(jnp.where(valid, xc, -jnp.inf), axis=1)
        else:
            s = jnp.sum(xc, axis=1)
            m = jnp.max(xc, axis=1)
        psum = s if psum is None else psum + s
        pmax = m if pmax is None else jnp.maximum(pmax, m)

    def conv_finalize(avg, mx):
        # Depth-padded [avg; max] planes built in vregs (bf16: MXU-native,
        # halves the slab-copy bytes).  f32 accumulation keeps precision.
        zer = jnp.zeros((NB, P, HW), jnp.bfloat16)
        planes = (jnp.concatenate([zer, avg.astype(jnp.bfloat16), zer], axis=1),
                  jnp.concatenate([zer, mx.astype(jnp.bfloat16), zer], axis=1))
        # Fused contraction LHS, column order (ic, kd, hw) to match t_ref rows.
        slabs = []
        for pad in planes:                      # ic = 0 (avg), 1 (max)
            for kd in range(K):
                slabs.append(lax.slice_in_dim(pad, kd, kd + D, axis=1))
        lhs = jnp.concatenate(slabs, axis=-1)                # (NB, D, 2*K*HW)
        lhs = lhs.reshape(NB * D, 2 * K * HW)
        # Single MXU matmul: M = NB*D rows amortize each 2*K*HW-deep weight
        # push; N = HW and the contraction dim are multiples of 128 (fills
        # v5e's 4x128 and v6e/v7x's 2x256 tiles).
        acc = jnp.dot(lhs, t_ref[...], preferred_element_type=jnp.float32)
        o_ref[...] = jax.nn.sigmoid(acc).reshape(NB, D, HW).astype(o_ref.dtype)

    if nc == 1:
        # Single C block: no scratch round-trip needed.
        conv_finalize(psum * (1.0 / C), pmax)
    else:
        @pl.when(c == 0)
        def _():
            sum_ref[...] = psum
            max_ref[...] = pmax

        @pl.when(c > 0)
        def _():
            sum_ref[...] = sum_ref[...] + psum
            max_ref[...] = jnp.maximum(max_ref[...], pmax)

        @pl.when(c == nc - 1)
        def _():
            conv_finalize(sum_ref[...] * (1.0 / C), max_ref[...])


# --------------------------------------------------------------------------
# Toeplitz weight builder (runs ONCE per weight / spatial plane)
# --------------------------------------------------------------------------
def _build_toeplitz(weight, H, W, P):
    """(1, 2, K, K, K) OIDHW conv weight -> (2*K*HW, HW) bf16 banded matrix.

    T[ic, kd, r, c] = weight[0, ic, kd, rh - ch + P, rw - cw + P] when that
    kernel tap is in range, else 0 (spatial zero padding folded in), where
    r = (rh, rw) indexes the input plane and c = (ch, cw) the output plane.
    Flattened row index = ic*K*HW + kd*HW + r, matching the kernel's LHS.
    """
    K = weight.shape[-1]
    w = jnp.asarray(weight)[0].astype(jnp.float32)     # (2, K, K, K)
    HW = H * W
    rr = jnp.arange(HW)
    rh, rw = rr // W, rr % W                           # input pixel
    cc = jnp.arange(HW)
    ch, cw = cc // W, cc % W                           # output pixel
    kh = rh[:, None] - ch[None, :] + P                 # (HW, HW)
    kw = rw[:, None] - cw[None, :] + P
    valid = (kh >= 0) & (kh < K) & (kw >= 0) & (kw < K)
    t = w[:, :, jnp.clip(kh, 0, K - 1), jnp.clip(kw, 0, K - 1)]   # (2,K,HW,HW)
    t = jnp.where(valid[None, None], t, 0.0)
    return t.reshape(2 * K * HW, HW).astype(jnp.bfloat16)


# --------------------------------------------------------------------------
# Wrapper
# --------------------------------------------------------------------------
def _vmem_physical_bytes():
    try:
        info = pltpu.get_tpu_info()
        v = getattr(info, "vmem_capacity_bytes", None)
        if v:
            return int(v)
    except Exception:
        pass
    return 64 * 1024 * 1024            # conservative default (v7x per-TC)


def _pick_nb(N, D, target_rows=256):
    """Batch block so NB*D rows feed each MXU weight push, but keep the
    parallel batch grid axis >= 2 steps when N >= 2 (v7x has 2 TCs)."""
    nb_cap = max(1, target_rows // max(D, 1))
    if N >= 2:
        nb_cap = min(nb_cap, max(1, N // 2))
    nb_cap = max(1, min(nb_cap, N))
    for nb in range(nb_cap, 0, -1):
        if N % nb == 0:
            return nb
    return 1


def _spatial_attention_pallas(x, t, *, K, P, H, W):
    """x: (N, C, D, H, W); t: (2*K*HW, HW) bf16. Returns (N, 1, D, H, W)."""
    N, C, D, H_, W_ = x.shape
    assert (H_, W_) == (H, W)
    HW = H * W
    x_l = x.reshape(N, C, D, HW)                    # lane-dense layout (free)

    itemsize = jnp.dtype(x.dtype).itemsize
    phys = _vmem_physical_bytes()
    budget = phys // 2                              # headroom for compiler scratch

    NB = _pick_nb(N, D)
    t_bytes = t.size * jnp.dtype(t.dtype).itemsize  # single VMEM copy (constant)
    out_blk_bytes = NB * D * HW * itemsize
    scratch_bytes = 2 * NB * D * HW * 4
    per_ch_bytes = NB * D * HW * itemsize           # one channel of one x block

    # Size the C block from the VMEM budget (x is double-buffered).
    avail = budget - t_bytes - 2 * out_blk_bytes - scratch_bytes
    C_BLK = max(1, min(C, avail // max(1, 2 * per_ch_bytes)))
    nc = pl.cdiv(C, C_BLK)
    mask_c = (C % C_BLK) != 0
    ch_sub = min(8, C_BLK)                          # sub-chunked reduction

    x_blk_bytes = C_BLK * per_ch_bytes
    needed = (t_bytes + 2 * x_blk_bytes + 2 * out_blk_bytes + scratch_bytes
              + (4 << 20))
    vmem_limit = int(min(max(needed, 16 << 20), int(phys * 0.85)))

    kernel = functools.partial(
        _sa_kernel, C=C, C_BLK=C_BLK, NB=NB, K=K, P=P, D=D, HW=HW,
        mask_c=mask_c, ch_sub=ch_sub)

    # TODO(synk): for large spatial planes, replace the dense (HW, HW)
    # Toeplitz with per-kh (W, W) factors or H-tiling with 2P halos; the
    # dense form grows as 2*K*HW^2 and would blow v7x's 64 MiB VMEM.
    out = pl.pallas_call(
        kernel,
        out_shape=jax.ShapeDtypeStruct((N, D, HW), x.dtype),
        grid_spec=pltpu.PrefetchScalarGridSpec(
            num_scalar_prefetch=0,
            grid=(N // NB, nc),                     # batch (parallel), C (reduction)
            in_specs=[
                pl.BlockSpec((NB, C_BLK, D, HW), lambda n, c: (n, c, 0, 0)),
                # Constant conv weights: whole array resident in VMEM once
                # (no pointless double-buffering of a grid-invariant operand).
                pl.BlockSpec(memory_space=pltpu.MemorySpace.VMEM),
            ],
            out_specs=pl.BlockSpec((NB, D, HW), lambda n, c: (n, 0, 0)),
            scratch_shapes=[
                pltpu.VMEM((NB, D, HW), jnp.float32),   # running channel sum
                pltpu.VMEM((NB, D, HW), jnp.float32),   # running channel max
            ],
        ),
        compiler_params=pltpu.CompilerParams(
            dimension_semantics=("parallel", "arbitrary"),
            vmem_limit_bytes=vmem_limit,
        ),
    )(x_l, t)
    return out.reshape(N, 1, D, H, W)


def make_spatial_attention(weight, kernel_size=7, *, H, W):
    """Build the forward pass for a fixed weight / spatial plane.

    The Toeplitz weight matrix is computed exactly once here (not in the
    per-call hot path) and cached as a bf16 device array.
    """
    assert kernel_size in (3, 7), "kernel size must be 3 or 7"
    K = kernel_size
    P = 3 if K == 7 else 1
    assert weight.shape == (1, 2, K, K, K)

    t = jax.block_until_ready(jax.device_put(_build_toeplitz(weight, H, W, P)))

    @jax.jit
    def _fwd(x, t_):
        return _spatial_attention_pallas(x, t_, K=K, P=P, H=H, W=W)

    def forward(x):
        return _fwd(x, t)

    return forward


# --------------------------------------------------------------------------
# Pure-JAX reference mirroring the PyTorch forward
# --------------------------------------------------------------------------
def spatial_attention_ref(x, weight):
    avg = jnp.mean(x, axis=1, keepdims=True)
    mx = jnp.max(x, axis=1, keepdims=True)
    cat = jnp.concatenate([avg, mx], axis=1)
    pad = (weight.shape[-1] - 1) // 2
    out = lax.conv_general_dilated(
        cat, weight,
        window_strides=(1, 1, 1),
        padding=[(pad, pad)] * 3,
        dimension_numbers=("NCDHW", "OIDHW", "NCDHW"),
        precision=lax.Precision.HIGHEST,
    )
    return jax.nn.sigmoid(out)


if __name__ == "__main__":
    key = jax.random.PRNGKey(0)
    kx, kw = jax.random.split(key)

    N, C, D, H, W = 2, 4, 8, 16, 16
    KSIZE = 7

    x = jax.random.normal(kx, (N, C, D, H, W), dtype=jnp.float32)
    # Conv3d(2, 1, 7, padding=3, bias=False) weight.
    weight = 0.05 * jax.random.normal(
        kw, (1, 2, KSIZE, KSIZE, KSIZE), dtype=jnp.float32)

    forward = make_spatial_attention(weight, kernel_size=KSIZE, H=H, W=W)
    out = jax.block_until_ready(forward(x))

    ref = jax.block_until_ready(spatial_attention_ref(x, weight))

    assert out.shape == (N, 1, D, H, W), out.shape
    # Tolerance covers bf16 conv weights/activations with f32 MXU
    # accumulation (intentional); real indexing/weight bugs show up as
    # errors orders of magnitude larger.
    err = float(jnp.max(jnp.abs(out - ref)))
    assert err < 5e-3, err
    print("KERNEL_OK")
</pallas_src>

<mosaic_0001>
module attributes {stable_mosaic.version = 11 : i64} {
  func.func @_sa_kernel(%arg0: i32, %arg1: i32, %arg2: memref<1x4x8x256xf32, #tpu.memory_space<vmem>>, %arg3: memref<3584x256xbf16, #tpu.memory_space<vmem>>, %arg4: memref<1x8x256xf32, #tpu.memory_space<vmem>>, %arg5: memref<1x8x256xf32, #tpu.memory_space<vmem>>, %arg6: memref<1x8x256xf32, #tpu.memory_space<vmem>>) attributes {dimension_semantics = [#tpu.dimension_semantics<parallel>, #tpu.dimension_semantics<arbitrary>], iteration_bounds = array<i64: 2, 1>, scalar_prefetch = 0 : i64, scratch_operands = 2 : i64, tpu.core_type = #tpu.core_type<tc>, window_params = [{transform_indices = @transform_0, window_bounds = array<i64: 1, 4, 8, 256>}, {pipeline_mode = #tpu.pipeline_mode<synchronous>, transform_indices = @transform_1, window_bounds = array<i64: 3584, 256>}, {transform_indices = @transform_2, window_bounds = array<i64: 1, 8, 256>}]} {
    %c0 = arith.constant 0 : index
    %c0_0 = arith.constant 0 : index
    %c0_1 = arith.constant 0 : index
    %c0_2 = arith.constant 0 : index
    %0 = vector.load %arg2[%c0, %c0_0, %c0_1, %c0_2] : memref<1x4x8x256xf32, #tpu.memory_space<vmem>>, vector<1x4x8x256xf32>
    %cst = arith.constant dense<0.000000e+00> : vector<1x8x256xf32>
    %1 = vector.multi_reduction <add>, %0, %cst [1] : vector<1x4x8x256xf32> to vector<1x8x256xf32>
    %cst_3 = arith.constant dense<0xFF800000> : vector<1x8x256xf32>
    %2 = vector.multi_reduction <maximumf>, %0, %cst_3 [1] : vector<1x4x8x256xf32> to vector<1x8x256xf32>
    %cst_4 = arith.constant 2.500000e-01 : f32
    %3 = vector.broadcast %cst_4 : f32 to vector<1x8x256xf32>
    %4 = arith.mulf %1, %3 : vector<1x8x256xf32>
    %cst_5 = arith.constant 0.000000e+00 : bf16
    %5 = vector.broadcast %cst_5 : bf16 to vector<1x3x256xbf16>
    %6 = arith.truncf %4 : vector<1x8x256xf32> to vector<1x8x256xbf16>
    %7 = tpu.concatenate %5, %6, %5 in 1 : vector<1x3x256xbf16>, vector<1x8x256xbf16>, vector<1x3x256xbf16> -> vector<1x14x256xbf16>
    %8 = arith.truncf %2 : vector<1x8x256xf32> to vector<1x8x256xbf16>
    %9 = tpu.concatenate %5, %8, %5 in 1 : vector<1x3x256xbf16>, vector<1x8x256xbf16>, vector<1x3x256xbf16> -> vector<1x14x256xbf16>
    %10 = vector.extract_strided_slice %7 {offsets = [0, 0, 0], sizes = [1, 8, 256], strides = [1, 1, 1]} : vector<1x14x256xbf16> to vector<1x8x256xbf16>
    %11 = vector.extract_strided_slice %7 {offsets = [0, 1, 0], sizes = [1, 8, 256], strides = [1, 1, 1]} : vector<1x14x256xbf16> to vector<1x8x256xbf16>
    %12 = vector.extract_strided_slice %7 {offsets = [0, 2, 0], sizes = [1, 8, 256], strides = [1, 1, 1]} : vector<1x14x256xbf16> to vector<1x8x256xbf16>
    %13 = vector.extract_strided_slice %7 {offsets = [0, 3, 0], sizes = [1, 8, 256], strides = [1, 1, 1]} : vector<1x14x256xbf16> to vector<1x8x256xbf16>
    %14 = vector.extract_strided_slice %7 {offsets = [0, 4, 0], sizes = [1, 8, 256], strides = [1, 1, 1]} : vector<1x14x256xbf16> to vector<1x8x256xbf16>
    %15 = vector.extract_strided_slice %7 {offsets = [0, 5, 0], sizes = [1, 8, 256], strides = [1, 1, 1]} : vector<1x14x256xbf16> to vector<1x8x256xbf16>
    %16 = vector.extract_strided_slice %7 {offsets = [0, 6, 0], sizes = [1, 8, 256], strides = [1, 1, 1]} : vector<1x14x256xbf16> to vector<1x8x256xbf16>
    %17 = vector.extract_strided_slice %9 {offsets = [0, 0, 0], sizes = [1, 8, 256], strides = [1, 1, 1]} : vector<1x14x256xbf16> to vector<1x8x256xbf16>
    %18 = vector.extract_strided_slice %9 {offsets = [0, 1, 0], sizes = [1, 8, 256], strides = [1, 1, 1]} : vector<1x14x256xbf16> to vector<1x8x256xbf16>
    %19 = vector.extract_strided_slice %9 {offsets = [0, 2, 0], sizes = [1, 8, 256], strides = [1, 1, 1]} : vector<1x14x256xbf16> to vector<1x8x256xbf16>
    %20 = vector.extract_strided_slice %9 {offsets = [0, 3, 0], sizes = [1, 8, 256], strides = [1, 1, 1]} : vector<1x14x256xbf16> to vector<1x8x256xbf16>
    %21 = vector.extract_strided_slice %9 {offsets = [0, 4, 0], sizes = [1, 8, 256], strides = [1, 1, 1]} : vector<1x14x256xbf16> to vector<1x8x256xbf16>
    %22 = vector.extract_strided_slice %9 {offsets = [0, 5, 0], sizes = [1, 8, 256], strides = [1, 1, 1]} : vector<1x14x256xbf16> to vector<1x8x256xbf16>
    %23 = vector.extract_strided_slice %9 {offsets = [0, 6, 0], sizes = [1, 8, 256], strides = [1, 1, 1]} : vector<1x14x256xbf16> to vector<1x8x256xbf16>
    %24 = tpu.concatenate %10, %11, %12, %13, %14, %15, %16, %17, %18, %19, %20, %21, %22, %23 in 2 : vector<1x8x256xbf16>, vector<1x8x256xbf16>, vector<1x8x256xbf16>, vector<1x8x256xbf16>, vector<1x8x256xbf16>, vector<1x8x256xbf16>, vector<1x8x256xbf16>, vector<1x8x256xbf16>, vector<1x8x256xbf16>, vector<1x8x256xbf16>, vector<1x8x256xbf16>, vector<1x8x256xbf16>, vector<1x8x256xbf16>, vector<1x8x256xbf16> -> vector<1x8x3584xbf16>
    %25 = vector.shape_cast %24 : vector<1x8x3584xbf16> to vector<8x3584xbf16>
    %c0_6 = arith.constant 0 : index
    %c0_7 = arith.constant 0 : index
    %26 = vector.load %arg3[%c0_6, %c0_7] : memref<3584x256xbf16, #tpu.memory_space<vmem>>, vector<3584x256xbf16>
    %cst_8 = arith.constant dense<0.000000e+00> : vector<8x256xf32>
    %27 = tpu.matmul %25, %26, %cst_8 {dimension_numbers = #tpu.dot_dimension_numbers<[1], [0], [0], [1], [0, 0, 1, 1], [], []>} : vector<8x3584xbf16>, vector<3584x256xbf16>, vector<8x256xf32> -> vector<8x256xf32>
    %28 = arith.negf %27 : vector<8x256xf32>
    %29 = math.exp %28 : vector<8x256xf32>
    %cst_9 = arith.constant 1.000000e+00 : f32
    %30 = vector.broadcast %cst_9 : f32 to vector<8x256xf32>
    %31 = arith.addf %30, %29 : vector<8x256xf32>
    %32 = arith.divf %30, %31 : vector<8x256xf32>
    %33 = vector.shape_cast %32 : vector<8x256xf32> to vector<1x8x256xf32>
    %c0_10 = arith.constant 0 : index
    %c0_11 = arith.constant 0 : index
    %c0_12 = arith.constant 0 : index
    %34 = vector.load %arg4[%c0_10, %c0_11, %c0_12] : memref<1x8x256xf32, #tpu.memory_space<vmem>>, vector<1x8x256xf32>
    tpu.vector_store %arg4[%c0_10, %c0_11, %c0_12], %33 {strides = array<i32>} : memref<1x8x256xf32, #tpu.memory_space<vmem>>, vector<1x8x256xf32>,
    return
  }
  func.func @transform_0(%arg0: i32, %arg1: i32) -> (i32, i32, i32, i32) {
    %c0_i32 = arith.constant 0 : i32
    %c0_i32_0 = arith.constant 0 : i32
    %c0_i32_1 = arith.constant 0 : i32
    return %arg0, %arg1, %c0_i32, %c0_i32_0 : i32, i32, i32, i32
  }
  func.func @transform_1(%arg0: i32, %arg1: i32) -> (i32, i32) {
    %c0_i32 = arith.constant 0 : i32
    %c0_i32_0 = arith.constant 0 : i32
    %c0_i32_1 = arith.constant 0 : i32
    return %c0_i32, %c0_i32_0 : i32, i32
  }
  func.func @transform_2(%arg0: i32, %arg1: i32) -> (i32, i32, i32) {
    %c0_i32 = arith.constant 0 : i32
    %c0_i32_0 = arith.constant 0 : i32
    %c0_i32_1 = arith.constant 0 : i32
    return %arg0, %c0_i32, %c0_i32_0 : i32, i32, i32
  }
}

</mosaic_0001>

<bundles_post_ra>
// kernel: _fwd.1
= control target key start
LH: loop header
LB: loop body
LE: loop exit
PB: predicated region body
PF: predicated region fallthrough
CT: control target
= control target key end

     0   :  { %7 = vsyncpa [#allocation5], 0  ;;  %s4978_s9 = smov 0   ;;  %s4980_s10 = smov 0   ;;  %s5185_s0 = inlined_call_operand.vmem [shape: f32[2,4,8,256], index: 0, kind: input, shape index: {}]   ;;  %s5186_s1 = inlined_call_operand.hbm [shape: bf16[3584,256], index: 1, kind: input, shape index: {}]   ;;  %s5187_s2 = inlined_call_operand.vmem [shape: f32[2,8,256], index: 2, kind: output, shape index: {}]  }
   0x1   :  { %s4982_s11 = smov 0  }
   0x2 LB: > { %s3720_s12 = sadd.s32 4294967295, %s4958_s11   ;;  %s25_s13 = sadd.s32 1, %s4954_s10  ;;  %s4958_s11 = sphi %s4982_s11, %s13_s11   ;;  %s4954_s10 = sphi %s4980_s10, %s5195_s10   ;;  %s4950_s9 = sphi %s4978_s9, %s5194_s9  }
   0x3   : > { %p27_p0 = scmp.ge.s32.totalorder %s25_s13, 2  ;;  %p3722_p1 = scmp.ge.s32.totalorder %s4958_s11, 1 }
   0x4   : > { %p105_p2 = scmp.lt.s32.totalorder %s4958_s11, 3  ;;  %p5003_p4 = scmp.eq.s32.totalorder %s3720_s12, 0 }
   0x5   : > { %s5197_s13 = smov (%p27_p0, %s25_s13), 0  ;;  %s4960_s16 = smov [#allocation4]  }
   0x6   : > { %p4999_p3 = pnand %p3722_p1, %p105_p2  ;;  %s117_s17 = sshll.u32 %s4960_s16, 4  ;;  %s118_s17 = int_to_ptr.vmem [resolvable:$true] %s117_s17 }
   0x7   : > { %s4917_s18 = scalar_lea.vmem %s118_s17, 57344  ;;  %p4925_p11 = scmp.lt.s32.totalorder %s118_s17, %s118_s17 }
   0x8   : > { %p4189_p5 = pneg %p4999_p3  ;;  %p4918_p8 = scmp.ne.s32.totalorder %s118_s17, %s4917_s18 }
   0x9   : > { %p4926_p12 = scmp.lt.s32.totalorder %s4917_s18, %s4917_s18 }
   0xa   : > { %p4190_p6 = pnand %p5003_p4, %p4189_p5 }
   0xb   : > { %p4927_p13 = por %p4926_p12, %p4925_p11 }
   0xc   : > { %p4908_p7 = pneg %p4190_p6 }
   0xe   : > { %p4920_p9 = pnand %p4918_p8, %p4908_p7 }
  0x10   : > { %p4921_p10 = pneg %p4920_p9 }
  0x12   : > { %p4928_p0 = pnand %p4927_p13, %p4921_p10 }
  0x14   : > { %4931 = shalt.err (!%p4928_p0)
}
  0x15   : > { %s4961_s19 = smov 128   ;;  %s4962_s20 = smov 8  }
  0x16   : > { %4192 = dma.hbm_to_vmem [thread:$0]  (!%p4190_p6), %s5186_s1, 57344, %s118_s17, [#allocation5], %s4961_s19, %s4961_s19, %s4962_s20  }
  0x17   : > { %147 = sbr.rel (%p4999_p3) target bundleno = 710 (0x2c6), region = 28 }
  0x1c   : > { %4945 = dma.done.wait (%p5003_p4), [#allocation5], 57344  }
  0x1d   : > { %4947 = vsyncadd (%p5003_p4), [#allocation5], 4294909952  ;;  %v4222_v0 = vld [vmem:[#allocation4 + $0x74] ss:$8 sps:$4 sm:$0xff]   ;;  %v4226_v2 = vld [vmem:[#allocation4 + $0x70] ss:$8 sps:$4 sm:$0xff]  }
  0x1e   : > { %v4224_v1 = vld [vmem:[#allocation4 + $0x174] ss:$8 sps:$4 sm:$0xff]   ;;  %3047 = vmatprep.subr.bf16.mxu0 %v4222_v0  ;;  %v4227_v3 = vld [vmem:[#allocation4 + $0x170] ss:$8 sps:$4 sm:$0xff]   ;;  %v4228_v4 = vld [vmem:[#allocation4 + $0x64] ss:$8 sps:$4 sm:$0xff]  }
  0x1f   : > { %3088 = vmatprep.subr.bf16.mxu1 %v4224_v1  ;;  %3048 = vmatpush1.bf16.msra.mxu0 %v4226_v2  ;;  %v4230_v5 = vld [vmem:[#allocation4 + $0x164] ss:$8 sps:$4 sm:$0xff]   ;;  %v4232_v6 = vld [vmem:[#allocation4 + $0x60] ss:$8 sps:$4 sm:$0xff]   ;;  %v4234_v8 = vld [vmem:[#allocation4 + $0x54] ss:$8 sps:$4 sm:$0xff]  }
  0x20   : > { %3089 = vmatpush1.bf16.msra.mxu1 %v4227_v3  ;;  %3049 = vmatprep.subr.bf16.mxu0 %v4228_v4  ;;  %v4233_v7 = vld [vmem:[#allocation4 + $0x160] ss:$8 sps:$4 sm:$0xff]   ;;  %v4236_v9 = vld [vmem:[#allocation4 + $0x154] ss:$8 sps:$4 sm:$0xff]   ;;  %v4238_v10 = vld [vmem:[#allocation4 + $0x50] ss:$8 sps:$4 sm:$0xff]  }
  0x21   : > { %3090 = vmatprep.subr.bf16.mxu1 %v4230_v5  ;;  %v4239_v11 = vld [vmem:[#allocation4 + $0x150] ss:$8 sps:$4 sm:$0xff]   ;;  %v4240_v12 = vld [vmem:[#allocation4 + $0x44] ss:$8 sps:$4 sm:$0xff]   ;;  %v4244_v14 = vld [vmem:[#allocation4 + $0x40] ss:$8 sps:$4 sm:$0xff]  }
  0x22   : > { %v4242_v13 = vld [vmem:[#allocation4 + $0x144] ss:$8 sps:$4 sm:$0xff]   ;;  %v4245_v15 = vld [vmem:[#allocation4 + $0x140] ss:$8 sps:$4 sm:$0xff]   ;;  %v4246_v16 = vld [vmem:[#allocation4 + $0x34] ss:$8 sps:$4 sm:$0xff]  }
  0x23   : > { %3050 = vmatpush1.bf16.msra.mxu0 %v4232_v6  ;;  %v4248_v17 = vld [vmem:[#allocation4 + $0x134] ss:$8 sps:$4 sm:$0xff]   ;;  %v4250_v18 = vld [vmem:[#allocation4 + $0x30] ss:$8 sps:$4 sm:$0xff]   ;;  %v4252_v20 = vld [vmem:[#allocation4 + $0x24] ss:$8 sps:$4 sm:$0xff]  }
  0x24   : > { %3091 = vmatpush1.bf16.msra.mxu1 %v4233_v7  ;;  %3051 = vmatprep.subr.bf16.mxu0 %v4234_v8  ;;  %v4251_v19 = vld [vmem:[#allocation4 + $0x130] ss:$8 sps:$4 sm:$0xff]   ;;  %v4254_v21 = vld [vmem:[#allocation4 + $0x124] ss:$8 sps:$4 sm:$0xff]   ;;  %v4256_v22 = vld [vmem:[#allocation4 + $0x20] ss:$8 sps:$4 sm:$0xff]  }
  0x25   : > { %3092 = vmatprep.subr.bf16.mxu1 %v4236_v9  ;;  %v4257_v23 = vld [vmem:[#allocation4 + $0x120] ss:$8 sps:$4 sm:$0xff]   ;;  %v4258_v24 = vld [vmem:[#allocation4 + $0x14] ss:$8 sps:$4 sm:$0xff]   ;;  %v4262_v26 = vld [vmem:[#allocation4 + $0x10] ss:$8 sps:$4 sm:$0xff]  }
  0x26   : > { %v4260_v25 = vld [vmem:[#allocation4 + $0x114] ss:$8 sps:$4 sm:$0xff]   ;;  %v4263_v27 = vld [vmem:[#allocation4 + $0x110] ss:$8 sps:$4 sm:$0xff]   ;;  %v4264_v28 = vld [vmem:[#allocation4 + $0x4] ss:$8 sps:$4 sm:$0xff]  }
  0x27   : > { %3052 = vmatpush1.bf16.msra.mxu0 %v4238_v10  ;;  %v4266_v29 = vld [vmem:[#allocation4 + $0x104] ss:$8 sps:$4 sm:$0xff]   ;;  %v4268_v30 = vld [vmem:[#allocation4] ss:$8 sps:$4 sm:$0xff]   ;;  %v4270_v32 = vld [vmem:[#allocation4 + $0xf4] ss:$8 sps:$4 sm:$0xff]  }
  0x28   : > { %3093 = vmatpush1.bf16.msra.mxu1 %v4239_v11  ;;  %3053 = vmatprep.subr.bf16.mxu0 %v4240_v12  ;;  %v4269_v31 = vld [vmem:[#allocation4 + $0x100] ss:$8 sps:$4 sm:$0xff]   ;;  %p175_p1 = scmp.lt.s32.totalorder %s4950_s9, 1  ;;  %v4272_v33 = vld [vmem:[#allocation4 + $0x1f4] ss:$8 sps:$4 sm:$0xff]   ;;  %vm233_vm0 = vcmask 1041408  }
  0x29   : > { %3094 = vmatprep.subr.bf16.mxu1 %v4242_v13  ;;  %v4274_v34 = vld [vmem:[#allocation4 + $0xf0] ss:$8 sps:$4 sm:$0xff]   ;;  %v4276_v36 = vld [vmem:[#allocation4 + $0xe4] ss:$8 sps:$4 sm:$0xff]   ;;  %v4280_v38 = vld [vmem:[#allocation4 + $0xe0] ss:$8 sps:$4 sm:$0xff]  }
  0x2a   : > { %v4275_v35 = vld [vmem:[#allocation4 + $0x1f0] ss:$8 sps:$4 sm:$0xff]   ;;  %s5199_s9 = smov (!%p175_p1, %s4950_s9), 1  ;;  %v4278_v37 = vld [vmem:[#allocation4 + $0x1e4] ss:$8 sps:$4 sm:$0xff]   ;;  %vm238_vm2 = vcmask 1045504  }
  0x2b   : > { %3054 = vmatpush1.bf16.msra.mxu0 %v4244_v14  ;;  %v4281_v39 = vld [vmem:[#allocation4 + $0x1e0] ss:$8 sps:$4 sm:$0xff]   ;;  %v4282_v40 = vld [vmem:[#allocation4 + $0xd4] ss:$8 sps:$4 sm:$0xff]   ;;  %s4183_s23 = sshll.u32 %s5199_s9, 6  ;;  %s4184_s27 = sshll.u32 %s5199_s9, 4 }
  0x2c   : > { %3095 = vmatpush1.bf16.msra.mxu1 %v4245_v15  ;;  %3055 = vmatprep.subr.bf16.mxu0 %v4246_v16  ;;  %v4284_v41 = vld [vmem:[#allocation4 + $0x1d4] ss:$8 sps:$4 sm:$0xff]   ;;  %v4286_v42 = vld [vmem:[#allocation4 + $0xd0] ss:$8 sps:$4 sm:$0xff]   ;;  %s5028_s26 = scalar_lea.vmem %s5185_s0, %s4183_s23  ;;  %v4288_v44 = vld [vmem:[#allocation4 + $0xc4] ss:$8 sps:$4 sm:$0xff]   ;;  %s189_s30 = scalar_lea.vmem %s5187_s2, %s4184_s27 }
  0x2d   : > { %3096 = vmatprep.subr.bf16.mxu1 %v4248_v17  ;;  %v4287_v43 = vld [vmem:[#allocation4 + $0x1d0] ss:$8 sps:$4 sm:$0xff]   ;;  %v4290_v45 = vld [vmem:[#allocation4 + $0x1c4] ss:$8 sps:$4 sm:$0xff]   ;;  %v4292_v46 = vld [vmem:[#allocation4 + $0xc0] ss:$8 sps:$4 sm:$0xff]  }
  0x2e   : > { %v4293_v47 = vld [vmem:[#allocation4 + $0x1c0] ss:$8 sps:$4 sm:$0xff]   ;;  %v4294_v49 = vld [vmem:[#allocation4 + $0xb4] ss:$8 sps:$4 sm:$0xff]   ;;  %v4298_v61 = vld [vmem:[#allocation4 + $0xb0] ss:$8 sps:$4 sm:$0xff]  }
  0x2f   : > { %3056 = vmatpush1.bf16.msra.mxu0 %v4250_v18  ;;  %v5031_v48 = vld [vmem:[%s5028_s26 + $0x8] sm:$0xff]  ;;  %v4296_v50 = vld [vmem:[#allocation4 + $0x1b4] ss:$8 sps:$4 sm:$0xff]   ;;  %v191_v54 = vld [vmem:[%s5028_s26] sm:$0xff]  ;;  %vm234_vm1 = vsmask.f32 1280 }
  0x30   : > { %3097 = vmatpush1.bf16.msra.mxu1 %v4251_v19  ;;  %3057 = vmatprep.subr.bf16.mxu0 %v4252_v20  ;;  %v5034_v51 = vld [vmem:[%s5028_s26 + $0x18] sm:$0xff]  ;;  %v5037_v52 = vld [vmem:[%s5028_s26 + $0x28] sm:$0xff]  ;;  %v193_v55 = vld [vmem:[%s5028_s26 + $0x10] sm:$0xff]  ;;  %vm239_vm3 = vsmask.f32 5376 }
  0x31   : > { %3098 = vmatprep.subr.bf16.mxu1 %v4254_v21  ;;  %v202_v53 = vadd.f32 %v5034_v51, %v5031_v48  ;;  %v195_v56 = vld [vmem:[%s5028_s26 + $0x20] sm:$0xff]  ;;  %v5045_v57 = vld [vmem:[%s5028_s26 + $0x38] sm:$0xff]  ;;  %v199_v58 = vadd.f32 %v193_v55, %v191_v54  ;;  %v197_v60 = vld [vmem:[%s5028_s26 + $0x30] sm:$0xff] }
  0x32   : > { %v4299_v62 = vld [vmem:[#allocation4 + $0x1b0] ss:$8 sps:$4 sm:$0xff]   ;;  %v4300_v0 = vld [vmem:[#allocation4 + $0xa4] ss:$8 sps:$4 sm:$0xff]   ;;  %v4304_v5 = vld [vmem:[#allocation4 + $0xa0] ss:$8 sps:$4 sm:$0xff]  }
  0x33   : > { %3058 = vmatpush1.bf16.msra.mxu0 %v4256_v22  ;;  %v203_v59 = vadd.f32 %v202_v53, %v5037_v52  ;;  %v200_v63 = vadd.f32 %v199_v58, %v195_v56  ;;  %v4302_v2 = vld [vmem:[#allocation4 + $0x1a4] ss:$8 sps:$4 sm:$0xff]   ;;  %v4305_v6 = vld [vmem:[#allocation4 + $0x1a0] ss:$8 sps:$4 sm:$0xff]   ;;  %v4306_v8 = vld [vmem:[#allocation4 + $0x94] ss:$8 sps:$4 sm:$0xff]  }
  0x34   : > { %3099 = vmatpush1.bf16.msra.mxu1 %v4257_v23  ;;  %3059 = vmatprep.subr.bf16.mxu0 %v4258_v24  ;;  %v4308_v10 = vld [vmem:[#allocation4 + $0x194] ss:$8 sps:$4 sm:$0xff]   ;;  %v4310_v14 = vld [vmem:[#allocation4 + $0x90] ss:$8 sps:$4 sm:$0xff]   ;;  %v4312_v20 = vld [vmem:[#allocation4 + $0x84] ss:$8 sps:$4 sm:$0xff]  }
  0x35   : > { %3100 = vmatprep.subr.bf16.mxu1 %v4260_v25  ;;  %v204_v1 = vadd.f32 %v203_v59, %v5045_v57  ;;  %v201_v3 = vadd.f32 %v200_v63, %v197_v60  ;;  %v4311_v17 = vld [vmem:[#allocation4 + $0x190] ss:$8 sps:$4 sm:$0xff]   ;;  %v4314_v21 = vld [vmem:[#allocation4 + $0x184] ss:$8 sps:$4 sm:$0xff]   ;;  %vm5052_vm4 = vmand %vm233_vm0, %vm234_vm1 }
  0x36   : > { %vm5058_vm5 = vmand %vm238_vm2, %vm239_vm3  ;;  %v4329_v53 = vld [vmem:[#allocation4 + $0x364] ss:$8 sps:$4 sm:$0xff]   ;;  %v4324_v54 = vld [vmem:[#allocation4 + $0x260] ss:$8 sps:$4 sm:$0xff]  }
  0x37   : > { %3060 = vmatpush1.bf16.msra.mxu0 %v4262_v26  ;;  %v212_v4 = vmul.f32 0.25, %v204_v1  ;;  %v211_v7 = vmul.f32 0.25, %v201_v3  ;;  %v4332_v56 = vld [vmem:[#allocation4 + $0x254] ss:$8 sps:$4 sm:$0xff]   ;;  %v4327_v59 = vld [vmem:[#allocation4 + $0x360] ss:$8 sps:$4 sm:$0xff]  }
  0x38   : > { %3101 = vmatpush1.bf16.msra.mxu1 %v4263_v27  ;;  %3061 = vmatprep.subr.bf16.mxu0 %v4264_v28  ;;  %v4316_v27 = vld [vmem:[#allocation4 + $0x80] ss:$8 sps:$4 sm:$0xff]   ;;  %v4333_v3 = vld [vmem:[#allocation4 + $0x350] ss:$8 sps:$4 sm:$0xff]   ;;  %v4617_v22 = vld [vmem:[#allocation4 + $0x964] ss:$8 sps:$4 sm:$0xff]  }
  0x39   : > { %3102 = vmatprep.subr.bf16.mxu1 %v4266_v29  ;;  %v214_v9 = vpack.c.bf16 %v212_v4, %v212_v4  ;;  %v213_v11 = vpack.c.bf16 %v211_v7, %v211_v7  ;;  %v4317_v29 = vld [vmem:[#allocation4 + $0x180] ss:$8 sps:$4 sm:$0xff]   ;;  %v4344_v7 = vld [vmem:[#allocation4 + $0x234] ss:$8 sps:$4 sm:$0xff]  }
  0x3a   : > { %v4615_v26 = vld [vmem:[#allocation4 + $0x960] ss:$8 sps:$4 sm:$0xff]  }
  0x3b   : > { %3062 = vmatpush1.bf16.msra.mxu0 %v4268_v30  ;;  %v224_v12 = vshrl.u32 %v214_v9, 16  ;;  %v227_v13 = vshll.u32 %v214_v9, 16  ;;  %v216_v15 = vshrl.u32 %v213_v11, 16  ;;  %v219_v16 = vshll.u32 %v213_v11, 16  ;;  %v4347_v9 = vld [vmem:[#allocation4 + $0x334] ss:$8 sps:$4 sm:$0xff]  }
  0x3c   : > { %3103 = vmatpush1.bf16.msra.mxu1 %v4269_v31  ;;  %3063 = vmatprep.subr.bf16.mxu0 %v4270_v32  ;;  %v4320_v31 = vld [vmem:[#allocation4 + $0x274] ss:$8 sps:$4 sm:$0xff]   ;;  %v4350_v11 = vld [vmem:[#allocation4 + $0x224] ss:$8 sps:$4 sm:$0xff]  }
  0x3d   : > { %3104 = vmatprep.subr.bf16.mxu1 %v4272_v33  ;;  %v226_v18 = vrot.slane %v224_v12, 6  ;;  %v229_v19 = vrot.slane %v227_v13, 7  ;;  %v218_v23 = vrot.slane %v216_v15, 6  ;;  %v221_v24 = vrot.slane %v219_v16, 7  ;;  %v4345_v12 = vld [vmem:[#allocation4 + $0x330] ss:$8 sps:$4 sm:$0xff]  }
  0x3e   : > { %v4353_v13 = vld [vmem:[#allocation4 + $0x324] ss:$8 sps:$4 sm:$0xff]   ;;  %v4356_v15 = vld [vmem:[#allocation4 + $0x214] ss:$8 sps:$4 sm:$0xff]   ;;  %v4351_v16 = vld [vmem:[#allocation4 + $0x320] ss:$8 sps:$4 sm:$0xff]  }
  0x3f   : > { %3064 = vmatpush2.bf16.msra.mxu0 %v4274_v34  ;;  %v230_v25 = vor.u32 %v229_v19, %v226_v18  ;;  %v222_v28 = vor.u32 %v221_v24, %v218_v23  ;;  %v4323_v34 = vld [vmem:[#allocation4 + $0x374] ss:$8 sps:$4 sm:$0xff]   ;;  %v4354_v18 = vld [vmem:[#allocation4 + $0x210] ss:$8 sps:$4 sm:$0xff]   ;;  %v4362_v19 = vld [vmem:[#allocation4 + $0x204] ss:$8 sps:$4 sm:$0xff]  }
  0x40   : > { %3105 = vmatpush2.bf16.msra.mxu1 %v4275_v35  ;;  %3065 = vmatprep.subr.bf16.mxu0 %v4276_v36  ;;  %v4360_v23 = vld [vmem:[#allocation4 + $0x200] ss:$8 sps:$4 sm:$0xff]   ;;  %v4368_v24 = vld [vmem:[#allocation4 + $0x2f4] ss:$8 sps:$4 sm:$0xff]  }
  0x41   : > { %3106 = vmatprep.subr.bf16.mxu1 %v4278_v37  ;;  %v237_v30 = vsel %vm5052_vm4, 0, %v230_v25  ;;  %v236_v33 = vsel %vm5052_vm4, 0, %v222_v28  ;;  %v4363_v25 = vld [vmem:[#allocation4 + $0x300] ss:$8 sps:$4 sm:$0xff]   ;;  %v4366_v28 = vld [vmem:[#allocation4 + $0x2f0] ss:$8 sps:$4 sm:$0xff]  }
  0x42   : > { %v5066_v32 = vsel %vm5058_vm5, %v237_v30, 0  ;;  %v5075_v37 = vsel %vm5058_vm5, %v236_v33, 0  ;;  %v4369_v30 = vld [vmem:[#allocation4 + $0x3f0] ss:$8 sps:$4 sm:$0xff]   ;;  %v4372_v33 = vld [vmem:[#allocation4 + $0x2e0] ss:$8 sps:$4 sm:$0xff]  }
  0x43   : > { %3066 = vmatpush2.bf16.msra.mxu0 %v4280_v38  ;;  %3079 = vmatprep.mubr.bf16.mxu0 %v5066_v32  ;;  %v275_v35 = vshrl.u32 %v5066_v32, 16  ;;  %v277_v36 = vshll.u32 %v5066_v32, 16  ;;  %v5078_v38 = vshrl.u32 %v5075_v37, 16 }
  0x44   : > { %3107 = vmatpush2.bf16.msra.mxu1 %v4281_v39  ;;  %3067 = vmatprep.subr.bf16.mxu0 %v4282_v40  ;;  %v5081_v39 = vshll.u32 %v5075_v37, 16 }
  0x45   : > { %3108 = vmatprep.subr.bf16.mxu1 %v4284_v41  ;;  %v279_v40 = vrot.slane %v277_v36, 1  ;;  %v4318_v41 = vld [vmem:[#allocation4 + $0x270] ss:$8 sps:$4 sm:$0xff]   ;;  %v304_v58 = vrot.slane %v275_v35, 2  ;;  %v305_v60 = vrot.slane %v277_v36, 3 }
  0x46   : > { %v302_v1 = vrot.slane %v5081_v39, 3 }
  0x47   : > { %3068 = vmatpush2.bf16.msra.mxu0 %v4286_v42  ;;  %v272_v42 = vrot.slane %v5081_v39, 1  ;;  %v5087_v63 = vor.u32 %v305_v60, %v304_v58  ;;  %v4399_v58 = vld [vmem:[#allocation4 + $0x3a0] ss:$8 sps:$4 sm:$0xff]   ;;  %v4402_v60 = vld [vmem:[#allocation4 + $0x290] ss:$8 sps:$4 sm:$0xff]  }
  0x48   : > { %3109 = vmatpush2.bf16.msra.mxu1 %v4287_v43  ;;  %3069 = vmatprep.subr.bf16.mxu0 %v4288_v44  ;;  %v4326_v43 = vld [vmem:[#allocation4 + $0x264] ss:$8 sps:$4 sm:$0xff]   ;;  %v292_v44 = vrot.slane %v275_v35, 1 }
  0x49   : > { %3110 = vmatprep.subr.bf16.mxu1 %v4290_v45  ;;  %v280_v45 = vor.u32 %v279_v40, %v275_v35  ;;  %v4375_v35 = vld [vmem:[#allocation4 + $0x3e0] ss:$8 sps:$4 sm:$0xff]   ;;  %v4378_v40 = vld [vmem:[#allocation4 + $0x2d0] ss:$8 sps:$4 sm:$0xff]  }
  0x4b   : > { %3070 = vmatpush2.bf16.msra.mxu0 %v4292_v46  ;;  %v4321_v46 = vld [vmem:[#allocation4 + $0x370] ss:$8 sps:$4 sm:$0xff]   ;;  %3120 = vmatprep.mubr.bf16.mxu1 %v280_v45  ;;  %v4392_v45 = vld [vmem:[#allocation4 + $0x2b4] ss:$8 sps:$4 sm:$0xff]  }
  0x4c   : > { %3111 = vmatpush2.bf16.msra.mxu1 %v4293_v47  ;;  %3071 = vmatprep.subr.bf16.mxu0 %v4294_v49  ;;  %v286_v47 = vrot.slane %v5066_v32, 1  ;;  %v293_v49 = vrot.slane %v277_v36, 2  ;;  %v4383_v36 = vld [vmem:[#allocation4 + $0x3d4] ss:$8 sps:$4 sm:$0xff]  }
  0x4d   : > { %3112 = vmatprep.subr.bf16.mxu1 %v4296_v50  ;;  %v273_v50 = vor.u32 %v272_v42, %v5078_v38  ;;  %v4381_v42 = vld [vmem:[#allocation4 + $0x3d0] ss:$8 sps:$4 sm:$0xff]  }
  0x4e   : > { %v294_v55 = vor.u32 %v293_v49, %v292_v44  ;;  %v4384_v44 = vld [vmem:[#allocation4 + $0x2c0] ss:$8 sps:$4 sm:$0xff]   ;;  %v4390_v49 = vld [vmem:[#allocation4 + $0x2b0] ss:$8 sps:$4 sm:$0xff]  }
  0x4f   : > { %3072 = vmatpush2.bf16.msra.mxu0 %v4298_v61  ;;  %v4335_v61 = vld [vmem:[#allocation4 + $0x354] ss:$8 sps:$4 sm:$0xff]  }
  0x50   : > { %3113 = vmatpush2.bf16.msra.mxu1 %v4299_v62  ;;  %3073 = vmatprep.subr.bf16.mxu0 %v4300_v0  ;;  %v4330_v62 = vld [vmem:[#allocation4 + $0x250] ss:$8 sps:$4 sm:$0xff]   ;;  %v301_v0 = vrot.slane %v5078_v38, 2 }
  0x51   : > { %3114 = vmatprep.subr.bf16.mxu1 %v4302_v2  ;;  %v4338_v2 = vld [vmem:[#allocation4 + $0x244] ss:$8 sps:$4 sm:$0xff]  }
  0x52   : > { %v5091_v4 = vor.u32 %v302_v1, %v301_v0  ;;  %v4413_v0 = vld [vmem:[#allocation4 + $0x384] ss:$8 sps:$4 sm:$0xff]   ;;  %v4408_v1 = vld [vmem:[#allocation4 + $0x280] ss:$8 sps:$4 sm:$0xff]  }
  0x53   : > { %3074 = vmatpush2.bf16.msra.mxu0 %v4304_v5  ;;  %v4341_v5 = vld [vmem:[#allocation4 + $0x344] ss:$8 sps:$4 sm:$0xff]  }
  0x54   : > { %3115 = vmatpush2.bf16.msra.mxu1 %v4305_v6  ;;  %3075 = vmatprep.subr.bf16.mxu0 %v4306_v8  ;;  %v4336_v6 = vld [vmem:[#allocation4 + $0x240] ss:$8 sps:$4 sm:$0xff]  }
  0x55   : > { %3116 = vmatprep.subr.bf16.mxu1 %v4308_v10  ;;  %v4339_v8 = vld [vmem:[#allocation4 + $0x340] ss:$8 sps:$4 sm:$0xff]   ;;  %v4342_v10 = vld [vmem:[#allocation4 + $0x230] ss:$8 sps:$4 sm:$0xff]  }
  0x57   : > { %3076 = vmatpush2.bf16.msra.mxu0 %v4310_v14  ;;  %v4348_v14 = vld [vmem:[#allocation4 + $0x220] ss:$8 sps:$4 sm:$0xff]  }
  0x58   : > { %3117 = vmatpush2.bf16.msra.mxu1 %v4311_v17  ;;  %3077 = vmatprep.subr.bf16.mxu0 %v4312_v20  ;;  %v4359_v17 = vld [vmem:[#allocation4 + $0x314] ss:$8 sps:$4 sm:$0xff]   ;;  %v4357_v20 = vld [vmem:[#allocation4 + $0x310] ss:$8 sps:$4 sm:$0xff]  }
  0x59   : > { %3118 = vmatprep.subr.bf16.mxu1 %v4314_v21  ;;  %v4365_v21 = vld [vmem:[#allocation4 + $0x304] ss:$8 sps:$4 sm:$0xff]  }
  0x5b   : > { %3078 = vmatpush2.bf16.msra.mxu0 %v4316_v27  ;;  %v4371_v27 = vld [vmem:[#allocation4 + $0x3f4] ss:$8 sps:$4 sm:$0xff]  }
  0x5c   : > { %3119 = vmatpush2.bf16.msra.mxu1 %v4317_v29  ;;  %3129 = vmatprep.subr.bf16.mxu0 %v4320_v31  ;;  %v4374_v29 = vld [vmem:[#allocation4 + $0x2e4] ss:$8 sps:$4 sm:$0xff]  }
  0x5d   : > { %3170 = vmatprep.subr.bf16.mxu1 %v4323_v34  ;;  %v4377_v31 = vld [vmem:[#allocation4 + $0x3e4] ss:$8 sps:$4 sm:$0xff]   ;;  %v4380_v34 = vld [vmem:[#allocation4 + $0x2d4] ss:$8 sps:$4 sm:$0xff]  }
  0x5e   : > { %3080 = vmatmul.mubr.bf16.vlgmr.msra.gmra.mxu0 %v5075_v37 }
  0x5f   : > { %3130 = vmatpush1.bf16.msra.mxu0 %v4318_v41  ;;  %3121 = vmatmul.mubr.bf16.vlgmr.msra.gmra.mxu1 %v273_v50  ;;  %v4386_v41 = vld [vmem:[#allocation4 + $0x2c4] ss:$8 sps:$4 sm:$0xff]  }
  0x60   : > { %3131 = vmatprep.subr.bf16.mxu0 %v4326_v43  ;;  %3171 = vmatpush1.bf16.msra.mxu1 %v4321_v46  ;;  %v4389_v43 = vld [vmem:[#allocation4 + $0x3c4] ss:$8 sps:$4 sm:$0xff]   ;;  %v4387_v46 = vld [vmem:[#allocation4 + $0x3c0] ss:$8 sps:$4 sm:$0xff]  }
  0x61   : > { %3161 = vmatprep.mubr.bf16.mxu0 %v286_v47  ;;  %3172 = vmatprep.subr.bf16.mxu1 %v4329_v53  ;;  %v4395_v47 = vld [vmem:[#allocation4 + $0x3b4] ss:$8 sps:$4 sm:$0xff]   ;;  %v4398_v50 = vld [vmem:[#allocation4 + $0x2a4] ss:$8 sps:$4 sm:$0xff]   ;;  %v4393_v53 = vld [vmem:[#allocation4 + $0x3b0] ss:$8 sps:$4 sm:$0xff]  }
  0x62   : > { %3202 = vmatprep.mubr.bf16.mxu1 %v294_v55  ;;  %v4396_v55 = vld [vmem:[#allocation4 + $0x2a0] ss:$8 sps:$4 sm:$0xff]  }
  0x63   : > { %3132 = vmatpush1.bf16.msra.mxu0 %v4324_v54  ;;  %v4401_v54 = vld [vmem:[#allocation4 + $0x3a4] ss:$8 sps:$4 sm:$0xff]  }
  0x64   : > { %3133 = vmatprep.subr.bf16.mxu0 %v4332_v56  ;;  %3173 = vmatpush1.bf16.msra.mxu1 %v4327_v59  ;;  %v4404_v56 = vld [vmem:[#allocation4 + $0x294] ss:$8 sps:$4 sm:$0xff]  }
  0x65   : > { %3174 = vmatprep.subr.bf16.mxu1 %v4335_v61  ;;  %v4407_v59 = vld [vmem:[#allocation4 + $0x394] ss:$8 sps:$4 sm:$0xff]   ;;  %v4410_v61 = vld [vmem:[#allocation4 + $0x284] ss:$8 sps:$4 sm:$0xff]  }
  0x67   : > { %3134 = vmatpush1.bf16.msra.mxu0 %v4330_v62  ;;  %v4405_v62 = vld [vmem:[#allocation4 + $0x390] ss:$8 sps:$4 sm:$0xff]  }
  0x68   : > { %3135 = vmatprep.subr.bf16.mxu0 %v4338_v2  ;;  %3175 = vmatpush1.bf16.msra.mxu1 %v4333_v3  ;;  %v289_v2 = vrot.slane %v5078_v38, 1  ;;  %v290_v3 = vrot.slane %v5081_v39, 2  ;;  %v4425_v38 = vld [vmem:[#allocation4 + $0x564] ss:$8 sps:$4 sm:$0xff]   ;;  %v4420_v39 = vld [vmem:[#allocation4 + $0x460] ss:$8 sps:$4 sm:$0xff]  }
  0x69   : > { %3176 = vmatprep.subr.bf16.mxu1 %v4341_v5  ;;  %v4416_v5 = vld [vmem:[#allocation4 + $0x474] ss:$8 sps:$4 sm:$0xff]  }
  0x6b   : > { %3136 = vmatpush1.bf16.msra.mxu0 %v4336_v6  ;;  %v4411_v6 = vld [vmem:[#allocation4 + $0x380] ss:$8 sps:$4 sm:$0xff]  }
  0x6c   : > { %3137 = vmatprep.subr.bf16.mxu0 %v4344_v7  ;;  %3177 = vmatpush1.bf16.msra.mxu1 %v4339_v8  ;;  %v285_v7 = vrot.slane %v5075_v37, 1  ;;  %v4419_v8 = vld [vmem:[#allocation4 + $0x574] ss:$8 sps:$4 sm:$0xff]  }
  0x6d   : > { %3178 = vmatprep.subr.bf16.mxu1 %v4347_v9  ;;  %v4414_v9 = vld [vmem:[#allocation4 + $0x470] ss:$8 sps:$4 sm:$0xff]  }
  0x6f   : > { %3138 = vmatpush1.bf16.msra.mxu0 %v4342_v10  ;;  %v298_v10 = vrot.slane %v5066_v32, 2 }
  0x70   : > { %3139 = vmatprep.subr.bf16.mxu0 %v4350_v11  ;;  %3179 = vmatpush1.bf16.msra.mxu1 %v4345_v12  ;;  %v291_v11 = vor.u32 %v290_v3, %v289_v2  ;;  %v4422_v12 = vld [vmem:[#allocation4 + $0x464] ss:$8 sps:$4 sm:$0xff]   ;;  %v4488_v3 = vld [vmem:[#allocation4 + $0x4b4] ss:$8 sps:$4 sm:$0xff]  }
  0x71   : > { %3180 = vmatprep.subr.bf16.mxu1 %v4353_v13  ;;  %v4417_v13 = vld [vmem:[#allocation4 + $0x570] ss:$8 sps:$4 sm:$0xff]  }
  0x73   : > { %3140 = vmatpush1.bf16.msra.mxu0 %v4348_v14  ;;  %v4428_v14 = vld [vmem:[#allocation4 + $0x454] ss:$8 sps:$4 sm:$0xff]  }
  0x74   : > { %3141 = vmatprep.subr.bf16.mxu0 %v4356_v15  ;;  %3181 = vmatpush1.bf16.msra.mxu1 %v4351_v16  ;;  %v4423_v15 = vld [vmem:[#allocation4 + $0x560] ss:$8 sps:$4 sm:$0xff]   ;;  %v4431_v16 = vld [vmem:[#allocation4 + $0x554] ss:$8 sps:$4 sm:$0xff]  }
  0x75   : > { %3182 = vmatprep.subr.bf16.mxu1 %v4359_v17  ;;  %v4426_v17 = vld [vmem:[#allocation4 + $0x450] ss:$8 sps:$4 sm:$0xff]  }
  0x77   : > { %3142 = vmatpush1.bf16.msra.mxu0 %v4354_v18  ;;  %v4434_v18 = vld [vmem:[#allocation4 + $0x444] ss:$8 sps:$4 sm:$0xff]  }
  0x78   : > { %3143 = vmatprep.subr.bf16.mxu0 %v4362_v19  ;;  %3183 = vmatpush1.bf16.msra.mxu1 %v4357_v20  ;;  %v4429_v19 = vld [vmem:[#allocation4 + $0x550] ss:$8 sps:$4 sm:$0xff]   ;;  %v4437_v20 = vld [vmem:[#allocation4 + $0x544] ss:$8 sps:$4 sm:$0xff]  }
  0x79   : > { %3184 = vmatprep.subr.bf16.mxu1 %v4365_v21  ;;  %v4432_v21 = vld [vmem:[#allocation4 + $0x440] ss:$8 sps:$4 sm:$0xff]  }
  0x7b   : > { %3144 = vmatpush1.bf16.msra.mxu0 %v4360_v23  ;;  %v4440_v23 = vld [vmem:[#allocation4 + $0x434] ss:$8 sps:$4 sm:$0xff]  }
  0x7c   : > { %3145 = vmatprep.subr.bf16.mxu0 %v4368_v24  ;;  %3185 = vmatpush1.bf16.msra.mxu1 %v4363_v25  ;;  %v4435_v24 = vld [vmem:[#allocation4 + $0x540] ss:$8 sps:$4 sm:$0xff]   ;;  %v4443_v25 = vld [vmem:[#allocation4 + $0x534] ss:$8 sps:$4 sm:$0xff]  }
  0x7d   : > { %3186 = vmatprep.subr.bf16.mxu1 %v4371_v27  ;;  %v4446_v27 = vld [vmem:[#allocation4 + $0x424] ss:$8 sps:$4 sm:$0xff]  }
  0x7f   : > { %3146 = vmatpush2.bf16.msra.mxu0 %v4366_v28  ;;  %v4441_v28 = vld [vmem:[#allocation4 + $0x530] ss:$8 sps:$4 sm:$0xff]  }
  0x80   : > { %3147 = vmatprep.subr.bf16.mxu0 %v4374_v29  ;;  %3187 = vmatpush2.bf16.msra.mxu1 %v4369_v30  ;;  %v4449_v29 = vld [vmem:[#allocation4 + $0x524] ss:$8 sps:$4 sm:$0xff]   ;;  %v4444_v30 = vld [vmem:[#allocation4 + $0x420] ss:$8 sps:$4 sm:$0xff]  }
  0x81   : > { %3188 = vmatprep.subr.bf16.mxu1 %v4377_v31  ;;  %v4452_v31 = vld [vmem:[#allocation4 + $0x414] ss:$8 sps:$4 sm:$0xff]  }
  0x83   : > { %3148 = vmatpush2.bf16.msra.mxu0 %v4372_v33  ;;  %v4447_v33 = vld [vmem:[#allocation4 + $0x520] ss:$8 sps:$4 sm:$0xff]  }
  0x84   : > { %3149 = vmatprep.subr.bf16.mxu0 %v4380_v34  ;;  %3189 = vmatpush2.bf16.msra.mxu1 %v4375_v35  ;;  %v4455_v34 = vld [vmem:[#allocation4 + $0x514] ss:$8 sps:$4 sm:$0xff]   ;;  %v4450_v35 = vld [vmem:[#allocation4 + $0x410] ss:$8 sps:$4 sm:$0xff]  }
  0x85   : > { %3190 = vmatprep.subr.bf16.mxu1 %v4383_v36  ;;  %v4458_v36 = vld [vmem:[#allocation4 + $0x404] ss:$8 sps:$4 sm:$0xff]  }
  0x87   : > { %3150 = vmatpush2.bf16.msra.mxu0 %v4378_v40  ;;  %v4453_v40 = vld [vmem:[#allocation4 + $0x510] ss:$8 sps:$4 sm:$0xff]  }
  0x88   : > { %3151 = vmatprep.subr.bf16.mxu0 %v4386_v41  ;;  %3191 = vmatpush2.bf16.msra.mxu1 %v4381_v42  ;;  %v4461_v41 = vld [vmem:[#allocation4 + $0x504] ss:$8 sps:$4 sm:$0xff]   ;;  %v4456_v42 = vld [vmem:[#allocation4 + $0x400] ss:$8 sps:$4 sm:$0xff]  }
  0x89   : > { %3192 = vmatprep.subr.bf16.mxu1 %v4389_v43  ;;  %v4464_v43 = vld [vmem:[#allocation4 + $0x4f4] ss:$8 sps:$4 sm:$0xff]  }
  0x8b   : > { %3152 = vmatpush2.bf16.msra.mxu0 %v4384_v44  ;;  %v4459_v44 = vld [vmem:[#allocation4 + $0x500] ss:$8 sps:$4 sm:$0xff]  }
  0x8c   : > { %3153 = vmatprep.subr.bf16.mxu0 %v4392_v45  ;;  %3193 = vmatpush2.bf16.msra.mxu1 %v4387_v46  ;;  %v4467_v45 = vld [vmem:[#allocation4 + $0x5f4] ss:$8 sps:$4 sm:$0xff]   ;;  %v4462_v46 = vld [vmem:[#allocation4 + $0x4f0] ss:$8 sps:$4 sm:$0xff]  }
  0x8d   : > { %3194 = vmatprep.subr.bf16.mxu1 %v4395_v47  ;;  %v4470_v47 = vld [vmem:[#allocation4 + $0x4e4] ss:$8 sps:$4 sm:$0xff]  }
  0x8f   : > { %3154 = vmatpush2.bf16.msra.mxu0 %v4390_v49  ;;  %v4465_v49 = vld [vmem:[#allocation4 + $0x5f0] ss:$8 sps:$4 sm:$0xff]  }
  0x90   : > { %3155 = vmatprep.subr.bf16.mxu0 %v4398_v50  ;;  %3195 = vmatpush2.bf16.msra.mxu1 %v4393_v53  ;;  %v4473_v50 = vld [vmem:[#allocation4 + $0x5e4] ss:$8 sps:$4 sm:$0xff]   ;;  %v4468_v53 = vld [vmem:[#allocation4 + $0x4e0] ss:$8 sps:$4 sm:$0xff]  }
  0x91   : > { %3196 = vmatprep.subr.bf16.mxu1 %v4401_v54  ;;  %v4476_v54 = vld [vmem:[#allocation4 + $0x4d4] ss:$8 sps:$4 sm:$0xff]  }
  0x93   : > { %3156 = vmatpush2.bf16.msra.mxu0 %v4396_v55  ;;  %v4471_v55 = vld [vmem:[#allocation4 + $0x5e0] ss:$8 sps:$4 sm:$0xff]  }
  0x94   : > { %3157 = vmatprep.subr.bf16.mxu0 %v4404_v56  ;;  %3197 = vmatpush2.bf16.msra.mxu1 %v4399_v58  ;;  %v4479_v56 = vld [vmem:[#allocation4 + $0x5d4] ss:$8 sps:$4 sm:$0xff]   ;;  %v4474_v58 = vld [vmem:[#allocation4 + $0x4d0] ss:$8 sps:$4 sm:$0xff]  }
  0x95   : > { %3198 = vmatprep.subr.bf16.mxu1 %v4407_v59  ;;  %v208_v59 = vmax.f32 %v5031_v48, %v5037_v52  ;;  %v4486_v48 = vld [vmem:[#allocation4 + $0x4b0] ss:$8 sps:$4 sm:$0xff]  }
  0x97   : > { %3158 = vmatpush2.bf16.msra.mxu0 %v4402_v60  ;;  %v209_v60 = vmax.f32 %v5034_v51, %v5045_v57  ;;  %v4494_v51 = vld [vmem:[#allocation4 + $0x4a4] ss:$8 sps:$4 sm:$0xff]   ;;  %v4489_v57 = vld [vmem:[#allocation4 + $0x5b0] ss:$8 sps:$4 sm:$0xff]  }
  0x98   : > { %3159 = vmatprep.subr.bf16.mxu0 %v4410_v61  ;;  %3199 = vmatpush2.bf16.msra.mxu1 %v4405_v62  ;;  %v4482_v61 = vld [vmem:[#allocation4 + $0x4c4] ss:$8 sps:$4 sm:$0xff]   ;;  %v4477_v62 = vld [vmem:[#allocation4 + $0x5d0] ss:$8 sps:$4 sm:$0xff]  }
  0x99   : > { %3200 = vmatprep.subr.bf16.mxu1 %v4413_v0  ;;  %v4485_v0 = vld [vmem:[#allocation4 + $0x5c4] ss:$8 sps:$4 sm:$0xff]   ;;  %v210_v2 = vmax.f32 %v208_v59, %v209_v60  ;;  %v4549_v60 = vld [vmem:[#allocation4 + $0x710] ss:$8 sps:$4 sm:$0xff]  }
  0x9a   : > { %v4554_v59 = vld [vmem:[#allocation4 + $0x604] ss:$8 sps:$4 sm:$0xff]  }
  0x9b   : > { %3160 = vmatpush2.bf16.msra.mxu0 %v4408_v1  ;;  %v4480_v1 = vld [vmem:[#allocation4 + $0x4c0] ss:$8 sps:$4 sm:$0xff]   ;;  %v244_v52 = vpack.c.bf16 %v210_v2, %v210_v2  ;;  %v4563_v2 = vld [vmem:[#allocation4 + $0x7f4] ss:$8 sps:$4 sm:$0xff]  }
  0x9c   : > { %3211 = vmatprep.subr.bf16.mxu0 %v4416_v5  ;;  %3201 = vmatpush2.bf16.msra.mxu1 %v4411_v6  ;;  %v4483_v5 = vld [vmem:[#allocation4 + $0x5c0] ss:$8 sps:$4 sm:$0xff]   ;;  %v4491_v6 = vld [vmem:[#allocation4 + $0x5b4] ss:$8 sps:$4 sm:$0xff]  }
  0x9d   : > { %3252 = vmatprep.subr.bf16.mxu1 %v4419_v8  ;;  %v4492_v8 = vld [vmem:[#allocation4 + $0x4a0] ss:$8 sps:$4 sm:$0xff]  }
  0x9e   : > { %3162 = vmatmul.mubr.bf16.vlgmr.msra.gmra.mxu0 %v285_v7  ;;  %v4497_v7 = vld [vmem:[#allocation4 + $0x5a4] ss:$8 sps:$4 sm:$0xff]  }
  0x9f   : > { %3212 = vmatpush1.bf16.msra.mxu0 %v4414_v9  ;;  %3243 = vmatprep.mubr.bf16.mxu0 %v298_v10  ;;  %v254_v9 = vshrl.u32 %v244_v52, 16  ;;  %v257_v10 = vshll.u32 %v244_v52, 16  ;;  %v4564_v52 = vld [vmem:[#allocation4 + $0x6e0] ss:$8 sps:$4 sm:$0xff]  }
  0xa0   : > { %3203 = vmatmul.mubr.bf16.vlgmr.msra.gmra.mxu1 %v291_v11  ;;  %3213 = vmatprep.subr.bf16.mxu0 %v4422_v12  ;;  %v4500_v11 = vld [vmem:[#allocation4 + $0x494] ss:$8 sps:$4 sm:$0xff]   ;;  %v4495_v12 = vld [vmem:[#allocation4 + $0x5a0] ss:$8 sps:$4 sm:$0xff]  }
  0xa1   : > { %3253 = vmatpush1.bf16.msra.mxu1 %v4417_v13  ;;  %3284 = vmatprep.mubr.bf16.mxu1 %v5087_v63  ;;  %v4438_v63 = vld [vmem:[#allocation4 + $0x430] ss:$8 sps:$4 sm:$0xff]   ;;  %v4503_v13 = vld [vmem:[#allocation4 + $0x594] ss:$8 sps:$4 sm:$0xff]  }
  0xa2   : > { %3254 = vmatprep.subr.bf16.mxu1 %v4425_v38  ;;  %v4498_v38 = vld [vmem:[#allocation4 + $0x490] ss:$8 sps:$4 sm:$0xff]  }
  0xa3   : > { %3214 = vmatpush1.bf16.msra.mxu0 %v4420_v39  ;;  %v256_v39 = vrot.slane %v254_v9, 6  ;;  %v4903_v9 = vld [vmem:[%s5028_s26 + $0x20] sm:$0xff] }
  0xa4   : > { %3215 = vmatprep.subr.bf16.mxu0 %v4428_v14  ;;  %v259_v14 = vrot.slane %v257_v10, 7 }
  0xa5   : > { %3255 = vmatpush1.bf16.msra.mxu1 %v4423_v15  ;;  %v4506_v15 = vld [vmem:[#allocation4 + $0x484] ss:$8 sps:$4 sm:$0xff]  }
  0xa6   : > { %3256 = vmatprep.subr.bf16.mxu1 %v4431_v16  ;;  %v4501_v16 = vld [vmem:[#allocation4 + $0x590] ss:$8 sps:$4 sm:$0xff]  }
  0xa7   : > { %3216 = vmatpush1.bf16.msra.mxu0 %v4426_v17  ;;  %v4509_v17 = vld [vmem:[#allocation4 + $0x584] ss:$8 sps:$4 sm:$0xff]  }
  0xa8   : > { %3217 = vmatprep.subr.bf16.mxu0 %v4434_v18  ;;  %v4504_v18 = vld [vmem:[#allocation4 + $0x480] ss:$8 sps:$4 sm:$0xff]  }
  0xa9   : > { %3257 = vmatpush1.bf16.msra.mxu1 %v4429_v19  ;;  %v260_v19 = vor.u32 %v259_v14, %v256_v39  ;;  %v4578_v39 = vld [vmem:[#allocation4 + $0x6c4] ss:$8 sps:$4 sm:$0xff]   ;;  %v4573_v14 = vld [vmem:[#allocation4 + $0x7d0] ss:$8 sps:$4 sm:$0xff]  }
  0xaa   : > { %3258 = vmatprep.subr.bf16.mxu1 %v4437_v20  ;;  %v4512_v20 = vld [vmem:[#allocation4 + $0x674] ss:$8 sps:$4 sm:$0xff]  }
  0xab   : > { %3218 = vmatpush1.bf16.msra.mxu0 %v4432_v21  ;;  %v4507_v21 = vld [vmem:[#allocation4 + $0x580] ss:$8 sps:$4 sm:$0xff]  }
  0xac   : > { %3219 = vmatprep.subr.bf16.mxu0 %v4440_v23  ;;  %v297_v23 = vrot.slane %v5075_v37, 2 }
  0xad   : > { %3259 = vmatpush1.bf16.msra.mxu1 %v4435_v24  ;;  %v4515_v24 = vld [vmem:[#allocation4 + $0x774] ss:$8 sps:$4 sm:$0xff]  }
  0xae   : > { %3260 = vmatprep.subr.bf16.mxu1 %v4443_v25  ;;  %v4510_v25 = vld [vmem:[#allocation4 + $0x670] ss:$8 sps:$4 sm:$0xff]  }
  0xaf   : > { %3220 = vmatpush1.bf16.msra.mxu0 %v4438_v63  ;;  %v310_v63 = vrot.slane %v5066_v32, 3  ;;  %v4524_v32 = vld [vmem:[#allocation4 + $0x654] ss:$8 sps:$4 sm:$0xff]  }
  0xb0   : > { %3221 = vmatprep.subr.bf16.mxu0 %v4446_v27  ;;  %v264_v27 = vsel %vm5052_vm4, 0, %v260_v19  ;;  %v4579_v19 = vld [vmem:[#allocation4 + $0x7c0] ss:$8 sps:$4 sm:$0xff]  }
  0xb1   : > { %3261 = vmatpush1.bf16.msra.mxu1 %v4441_v28  ;;  %v4518_v28 = vld [vmem:[#allocation4 + $0x664] ss:$8 sps:$4 sm:$0xff]  }
  0xb2   : > { %3262 = vmatprep.subr.bf16.mxu1 %v4449_v29  ;;  %v4513_v29 = vld [vmem:[#allocation4 + $0x770] ss:$8 sps:$4 sm:$0xff]  }
  0xb3   : > { %3222 = vmatpush1.bf16.msra.mxu0 %v4444_v30  ;;  %v4521_v30 = vld [vmem:[#allocation4 + $0x764] ss:$8 sps:$4 sm:$0xff]  }
  0xb4   : > { %3223 = vmatprep.subr.bf16.mxu0 %v4452_v31  ;;  %v5108_v31 = vsel %vm5058_vm5, %v264_v27, 0 }
  0xb5   : > { %3263 = vmatpush1.bf16.msra.mxu1 %v4447_v33  ;;  %v4516_v33 = vld [vmem:[#allocation4 + $0x660] ss:$8 sps:$4 sm:$0xff]  }
  0xb6   : > { %3264 = vmatprep.subr.bf16.mxu1 %v4455_v34  ;;  %v4519_v34 = vld [vmem:[#allocation4 + $0x760] ss:$8 sps:$4 sm:$0xff]  }
  0xb7   : > { %3224 = vmatpush1.bf16.msra.mxu0 %v4450_v35  ;;  %v4527_v35 = vld [vmem:[#allocation4 + $0x754] ss:$8 sps:$4 sm:$0xff]  }
  0xb8   : > { %3225 = vmatprep.subr.bf16.mxu0 %v4458_v36  ;;  %v4522_v36 = vld [vmem:[#allocation4 + $0x650] ss:$8 sps:$4 sm:$0xff]  }
  0xb9   : > { %3265 = vmatpush1.bf16.msra.mxu1 %v4453_v40  ;;  %v4530_v40 = vld [vmem:[#allocation4 + $0x644] ss:$8 sps:$4 sm:$0xff]  }
  0xba   : > { %3266 = vmatprep.subr.bf16.mxu1 %v4461_v41  ;;  %v4525_v41 = vld [vmem:[#allocation4 + $0x750] ss:$8 sps:$4 sm:$0xff]  }
  0xbb   : > { %3226 = vmatpush1.bf16.msra.mxu0 %v4456_v42  ;;  %v4533_v42 = vld [vmem:[#allocation4 + $0x744] ss:$8 sps:$4 sm:$0xff]  }
  0xbc   : > { %3227 = vmatprep.subr.bf16.mxu0 %v4464_v43  ;;  %v4528_v43 = vld [vmem:[#allocation4 + $0x640] ss:$8 sps:$4 sm:$0xff]  }
  0xbd   : > { %3267 = vmatpush1.bf16.msra.mxu1 %v4459_v44  ;;  %v4531_v44 = vld [vmem:[#allocation4 + $0x740] ss:$8 sps:$4 sm:$0xff]  }
  0xbe   : > { %3268 = vmatprep.subr.bf16.mxu1 %v4467_v45  ;;  %v4539_v45 = vld [vmem:[#allocation4 + $0x734] ss:$8 sps:$4 sm:$0xff]  }
  0xbf   : > { %3228 = vmatpush2.bf16.msra.mxu0 %v4462_v46  ;;  %v4534_v46 = vld [vmem:[#allocation4 + $0x630] ss:$8 sps:$4 sm:$0xff]  }
  0xc0   : > { %3229 = vmatprep.subr.bf16.mxu0 %v4470_v47  ;;  %v4542_v47 = vld [vmem:[#allocation4 + $0x624] ss:$8 sps:$4 sm:$0xff]  }
  0xc1   : > { %3269 = vmatpush2.bf16.msra.mxu1 %v4465_v49  ;;  %v4537_v49 = vld [vmem:[#allocation4 + $0x730] ss:$8 sps:$4 sm:$0xff]  }
  0xc2   : > { %3270 = vmatprep.subr.bf16.mxu1 %v4473_v50  ;;  %v4545_v50 = vld [vmem:[#allocation4 + $0x724] ss:$8 sps:$4 sm:$0xff]  }
  0xc3   : > { %3230 = vmatpush2.bf16.msra.mxu0 %v4468_v53  ;;  %v4540_v53 = vld [vmem:[#allocation4 + $0x620] ss:$8 sps:$4 sm:$0xff]  }
  0xc4   : > { %3231 = vmatprep.subr.bf16.mxu0 %v4476_v54  ;;  %v4548_v54 = vld [vmem:[#allocation4 + $0x614] ss:$8 sps:$4 sm:$0xff]  }
  0xc5   : > { %3271 = vmatpush2.bf16.msra.mxu1 %v4471_v55  ;;  %v4543_v55 = vld [vmem:[#allocation4 + $0x720] ss:$8 sps:$4 sm:$0xff]  }
  0xc6   : > { %3272 = vmatprep.subr.bf16.mxu1 %v4479_v56  ;;  %v4551_v56 = vld [vmem:[#allocation4 + $0x714] ss:$8 sps:$4 sm:$0xff]  }
  0xc7   : > { %3232 = vmatpush2.bf16.msra.mxu0 %v4474_v58  ;;  %v4546_v58 = vld [vmem:[#allocation4 + $0x610] ss:$8 sps:$4 sm:$0xff]  }
  0xc8   : > { %3233 = vmatprep.subr.bf16.mxu0 %v4482_v61  ;;  %v4557_v61 = vld [vmem:[#allocation4 + $0x704] ss:$8 sps:$4 sm:$0xff]  }
  0xc9   : > { %3273 = vmatpush2.bf16.msra.mxu1 %v4477_v62  ;;  %v4552_v62 = vld [vmem:[#allocation4 + $0x600] ss:$8 sps:$4 sm:$0xff]  }
  0xca   : > { %3274 = vmatprep.subr.bf16.mxu1 %v4485_v0  ;;  %v4560_v0 = vld [vmem:[#allocation4 + $0x6f4] ss:$8 sps:$4 sm:$0xff]  }
  0xcb   : > { %3234 = vmatpush2.bf16.msra.mxu0 %v4480_v1  ;;  %v4555_v1 = vld [vmem:[#allocation4 + $0x700] ss:$8 sps:$4 sm:$0xff]  }
  0xcc   : > { %3235 = vmatprep.subr.bf16.mxu0 %v4488_v3  ;;  %v4558_v3 = vld [vmem:[#allocation4 + $0x6f0] ss:$8 sps:$4 sm:$0xff]  }
  0xcd   : > { %3275 = vmatpush2.bf16.msra.mxu1 %v4483_v5  ;;  %v4566_v5 = vld [vmem:[#allocation4 + $0x6e4] ss:$8 sps:$4 sm:$0xff]  }
  0xce   : > { %3276 = vmatprep.subr.bf16.mxu1 %v4491_v6  ;;  %v4561_v6 = vld [vmem:[#allocation4 + $0x7f0] ss:$8 sps:$4 sm:$0xff]  }
  0xcf   : > { %3236 = vmatpush2.bf16.msra.mxu0 %v4486_v48  ;;  %v4569_v48 = vld [vmem:[#allocation4 + $0x7e4] ss:$8 sps:$4 sm:$0xff]  }
  0xd0   : > { %3237 = vmatprep.subr.bf16.mxu0 %v4494_v51  ;;  %v4572_v51 = vld [vmem:[#allocation4 + $0x6d4] ss:$8 sps:$4 sm:$0xff]  }
  0xd1   : > { %3277 = vmatpush2.bf16.msra.mxu1 %v4489_v57  ;;  %v4567_v57 = vld [vmem:[#allocation4 + $0x7e0] ss:$8 sps:$4 sm:$0xff]  }
  0xd2   : > { %3278 = vmatprep.subr.bf16.mxu1 %v4497_v7  ;;  %v4575_v7 = vld [vmem:[#allocation4 + $0x7d4] ss:$8 sps:$4 sm:$0xff]  }
  0xd3   : > { %3238 = vmatpush2.bf16.msra.mxu0 %v4492_v8  ;;  %v4902_v8 = vld [vmem:[%s5028_s26] sm:$0xff] }
  0xd4   : > { %3239 = vmatprep.subr.bf16.mxu0 %v4500_v11  ;;  %v205_v10 = vmax.f32 %v4902_v8, %v4903_v9  ;;  %v4904_v11 = vld [vmem:[%s5028_s26 + $0x10] sm:$0xff]  ;;  %v4626_v9 = vld [vmem:[#allocation4 + $0x844] ss:$8 sps:$4 sm:$0xff]  }
  0xd5   : > { %3279 = vmatpush2.bf16.msra.mxu1 %v4495_v12  ;;  %v4905_v12 = vld [vmem:[%s5028_s26 + $0x30] sm:$0xff] }
  0xd6   : > { %3280 = vmatprep.subr.bf16.mxu1 %v4503_v13  ;;  %v206_v13 = vmax.f32 %v4904_v11, %v4905_v12  ;;  %v4624_v11 = vld [vmem:[#allocation4 + $0x840] ss:$8 sps:$4 sm:$0xff]   ;;  %v4629_v12 = vld [vmem:[#allocation4 + $0x944] ss:$8 sps:$4 sm:$0xff]  }
  0xd7   : > { %3240 = vmatpush2.bf16.msra.mxu0 %v4498_v38  ;;  %v4570_v38 = vld [vmem:[#allocation4 + $0x6d0] ss:$8 sps:$4 sm:$0xff]  }
  0xd8   : > { %3241 = vmatprep.subr.bf16.mxu0 %v4506_v15  ;;  %v4581_v15 = vld [vmem:[#allocation4 + $0x7c4] ss:$8 sps:$4 sm:$0xff]  }
  0xd9   : > { %3281 = vmatpush2.bf16.msra.mxu1 %v4501_v16  ;;  %v207_v16 = vmax.f32 %v205_v10, %v206_v13  ;;  %v4632_v13 = vld [vmem:[#allocation4 + $0x834] ss:$8 sps:$4 sm:$0xff]  }
  0xda   : > { %3282 = vmatprep.subr.bf16.mxu1 %v4509_v17  ;;  %v4576_v17 = vld [vmem:[#allocation4 + $0x6c0] ss:$8 sps:$4 sm:$0xff]  }
  0xdb   : > { %3242 = vmatpush2.bf16.msra.mxu0 %v4504_v18  ;;  %v4584_v18 = vld [vmem:[#allocation4 + $0x6b4] ss:$8 sps:$4 sm:$0xff]  }
  0xdc   : > { %3293 = vmatprep.subr.bf16.mxu0 %v4512_v20  ;;  %v4587_v20 = vld [vmem:[#allocation4 + $0x7b4] ss:$8 sps:$4 sm:$0xff]  }
  0xdd   : > { %3283 = vmatpush2.bf16.msra.mxu1 %v4507_v21  ;;  %v243_v21 = vpack.c.bf16 %v207_v16, %v207_v16  ;;  %v4633_v16 = vld [vmem:[#allocation4 + $0x930] ss:$8 sps:$4 sm:$0xff]  }
  0xde   : > { %3244 = vmatmul.mubr.bf16.vlgmr.msra.gmra.mxu0 %v297_v23  ;;  %3334 = vmatprep.subr.bf16.mxu1 %v4515_v24  ;;  %v4582_v23 = vld [vmem:[#allocation4 + $0x6b0] ss:$8 sps:$4 sm:$0xff]   ;;  %v4590_v24 = vld [vmem:[#allocation4 + $0x6a4] ss:$8 sps:$4 sm:$0xff]  }
  0xdf   : > { %3294 = vmatpush1.bf16.msra.mxu0 %v4510_v25  ;;  %3325 = vmatprep.mubr.bf16.mxu0 %v310_v63  ;;  %v4585_v25 = vld [vmem:[#allocation4 + $0x7b0] ss:$8 sps:$4 sm:$0xff]   ;;  %v4593_v63 = vld [vmem:[#allocation4 + $0x7a4] ss:$8 sps:$4 sm:$0xff]   ;;  %v246_v27 = vshrl.u32 %v243_v21, 16 }
  0xe0   : > { %3285 = vmatmul.mubr.bf16.vlgmr.msra.gmra.mxu1 %v5091_v4  ;;  %3295 = vmatprep.subr.bf16.mxu0 %v4518_v28  ;;  %v4536_v4 = vld [vmem:[#allocation4 + $0x634] ss:$8 sps:$4 sm:$0xff]   ;;  %v249_v28 = vshll.u32 %v243_v21, 16  ;;  %v4642_v21 = vld [vmem:[#allocation4 + $0x810] ss:$8 sps:$4 sm:$0xff]  }
  0xe1   : > { %3335 = vmatpush1.bf16.msra.mxu1 %v4513_v29  ;;  %3366 = vmatprep.mubr.bf16.mxu1 %v5108_v31  ;;  %v4588_v29 = vld [vmem:[#allocation4 + $0x6a0] ss:$8 sps:$4 sm:$0xff]  }
  0xe2   : > { %3336 = vmatprep.subr.bf16.mxu1 %v4521_v30  ;;  %v4596_v30 = vld [vmem:[#allocation4 + $0x694] ss:$8 sps:$4 sm:$0xff]  }
  0xe3   : > { %3296 = vmatpush1.bf16.msra.mxu0 %v4516_v33  ;;  %v4591_v33 = vld [vmem:[#allocation4 + $0x7a0] ss:$8 sps:$4 sm:$0xff]  }
  0xe4   : > { %3297 = vmatprep.subr.bf16.mxu0 %v4524_v32  ;;  %v4599_v32 = vld [vmem:[#allocation4 + $0x794] ss:$8 sps:$4 sm:$0xff]  }
  0xe5   : > { %3337 = vmatpush1.bf16.msra.mxu1 %v4519_v34  ;;  %v248_v34 = vrot.slane %v246_v27, 6  ;;  %v4653_v27 = vld [vmem:[#allocation4 + $0x904] ss:$8 sps:$4 sm:$0xff]  }
  0xe6   : > { %3338 = vmatprep.subr.bf16.mxu1 %v4527_v35  ;;  %v251_v35 = vrot.slane %v249_v28, 7  ;;  %v4656_v28 = vld [vmem:[#allocation4 + $0x8f4] ss:$8 sps:$4 sm:$0xff]  }
  0xe7   : > { %3298 = vmatpush1.bf16.msra.mxu0 %v4522_v36  ;;  %v4594_v36 = vld [vmem:[#allocation4 + $0x690] ss:$8 sps:$4 sm:$0xff]  }
  0xe8   : > { %3299 = vmatprep.subr.bf16.mxu0 %v4530_v40  ;;  %v5117_v40 = vshll.u32 %v5108_v31, 16 }
  0xe9   : > { %3339 = vmatpush1.bf16.msra.mxu1 %v4525_v41  ;;  %v4602_v41 = vld [vmem:[#allocation4 + $0x684] ss:$8 sps:$4 sm:$0xff]  }
  0xea   : > { %3340 = vmatprep.subr.bf16.mxu1 %v4533_v42  ;;  %v4597_v42 = vld [vmem:[#allocation4 + $0x790] ss:$8 sps:$4 sm:$0xff]  }
  0xeb   : > { %3300 = vmatpush1.bf16.msra.mxu0 %v4528_v43  ;;  %v4605_v43 = vld [vmem:[#allocation4 + $0x784] ss:$8 sps:$4 sm:$0xff]  }
  0xec   : > { %3301 = vmatprep.subr.bf16.mxu0 %v4536_v4  ;;  %v252_v4 = vor.u32 %v251_v35, %v248_v34  ;;  %v4657_v34 = vld [vmem:[#allocation4 + $0x9f0] ss:$8 sps:$4 sm:$0xff]   ;;  %v4660_v35 = vld [vmem:[#allocation4 + $0x8e0] ss:$8 sps:$4 sm:$0xff]  }
  0xed   : > { %3341 = vmatpush1.bf16.msra.mxu1 %v4531_v44  ;;  %v4600_v44 = vld [vmem:[#allocation4 + $0x680] ss:$8 sps:$4 sm:$0xff]  }
  0xee   : > { %3342 = vmatprep.subr.bf16.mxu1 %v4539_v45  ;;  %v5120_v45 = vshrl.u32 %v5108_v31, 16 }
  0xef   : > { %3302 = vmatpush1.bf16.msra.mxu0 %v4534_v46  ;;  %v325_v46 = vrot.slane %v5117_v40, 1 }
  0xf0   : > { %3303 = vmatprep.subr.bf16.mxu0 %v4542_v47  ;;  %v4608_v47 = vld [vmem:[#allocation4 + $0x874] ss:$8 sps:$4 sm:$0xff]  }
  0xf1   : > { %3343 = vmatpush1.bf16.msra.mxu1 %v4537_v49  ;;  %v4603_v49 = vld [vmem:[#allocation4 + $0x780] ss:$8 sps:$4 sm:$0xff]  }
  0xf2   : > { %3344 = vmatprep.subr.bf16.mxu1 %v4545_v50  ;;  %v309_v50 = vrot.slane %v5075_v37, 3  ;;  %v4612_v37 = vld [vmem:[#allocation4 + $0x860] ss:$8 sps:$4 sm:$0xff]  }
  0xf3   : > { %3304 = vmatpush1.bf16.msra.mxu0 %v4540_v53  ;;  %v263_v53 = vsel %vm5052_vm4, 0, %v252_v4  ;;  %v4666_v4 = vld [vmem:[#allocation4 + $0x8d0] ss:$8 sps:$4 sm:$0xff]  }
  0xf4   : > { %3305 = vmatprep.subr.bf16.mxu0 %v4548_v54  ;;  %v4611_v54 = vld [vmem:[#allocation4 + $0x974] ss:$8 sps:$4 sm:$0xff]  }
  0xf5   : > { %3345 = vmatpush1.bf16.msra.mxu1 %v4543_v55  ;;  %v4606_v55 = vld [vmem:[#allocation4 + $0x870] ss:$8 sps:$4 sm:$0xff]  }
  0xf6   : > { %3346 = vmatprep.subr.bf16.mxu1 %v4551_v56  ;;  %v326_v56 = vor.u32 %v325_v46, %v5120_v45  ;;  %v4669_v46 = vld [vmem:[#allocation4 + $0x9d0] ss:$8 sps:$4 sm:$0xff]  }
  0xf7   : > { %3306 = vmatpush1.bf16.msra.mxu0 %v4546_v58  ;;  %v4614_v58 = vld [vmem:[#allocation4 + $0x864] ss:$8 sps:$4 sm:$0xff]  }
  0xf8   : > { %3307 = vmatprep.subr.bf16.mxu0 %v4554_v59  ;;  %v5129_v59 = vsel %vm5058_vm5, %v263_v53, 0  ;;  %v4675_v53 = vld [vmem:[#allocation4 + $0x9c0] ss:$8 sps:$4 sm:$0xff]  }
  0xf9   : > { %3347 = vmatpush1.bf16.msra.mxu1 %v4549_v60  ;;  %v4609_v60 = vld [vmem:[#allocation4 + $0x970] ss:$8 sps:$4 sm:$0xff]  }
  0xfa   : > { %3348 = vmatprep.subr.bf16.mxu1 %v4557_v61  ;;  %v332_v61 = vrot.slane %v5108_v31, 1 }
  0xfb   : > { %3308 = vmatpush1.bf16.msra.mxu0 %v4552_v62 }
  0xfc   : > { %3309 = vmatprep.subr.bf16.mxu0 %v4560_v0 }
  0xfd   : > { %3349 = vmatpush1.bf16.msra.mxu1 %v4555_v1 }
  0xfe   : > { %3350 = vmatprep.subr.bf16.mxu1 %v4563_v2  ;;  %v4620_v2 = vld [vmem:[#allocation4 + $0x854] ss:$8 sps:$4 sm:$0xff]  }
  0xff   : > { %3310 = vmatpush2.bf16.msra.mxu0 %v4558_v3 }
 0x100   : > { %3311 = vmatprep.subr.bf16.mxu0 %v4566_v5 }
 0x101   : > { %3351 = vmatpush2.bf16.msra.mxu1 %v4561_v6 }
 0x102   : > { %3352 = vmatprep.subr.bf16.mxu1 %v4569_v48  ;;  %v4623_v48 = vld [vmem:[#allocation4 + $0x954] ss:$8 sps:$4 sm:$0xff]  }
 0x103   : > { %3312 = vmatpush2.bf16.msra.mxu0 %v4564_v52 }
 0x104   : > { %3313 = vmatprep.subr.bf16.mxu0 %v4572_v51  ;;  %v4618_v51 = vld [vmem:[#allocation4 + $0x850] ss:$8 sps:$4 sm:$0xff]  }
 0x105   : > { %3353 = vmatpush2.bf16.msra.mxu1 %v4567_v57  ;;  %v4621_v57 = vld [vmem:[#allocation4 + $0x950] ss:$8 sps:$4 sm:$0xff]  }
 0x106   : > { %3354 = vmatprep.subr.bf16.mxu1 %v4575_v7 }
 0x107   : > { %3314 = vmatpush2.bf16.msra.mxu0 %v4570_v38  ;;  %v4627_v38 = vld [vmem:[#allocation4 + $0x940] ss:$8 sps:$4 sm:$0xff]  }
 0x108   : > { %3315 = vmatprep.subr.bf16.mxu0 %v4578_v39  ;;  %v4630_v39 = vld [vmem:[#allocation4 + $0x830] ss:$8 sps:$4 sm:$0xff]  }
 0x109   : > { %3355 = vmatpush2.bf16.msra.mxu1 %v4573_v14  ;;  %v4635_v14 = vld [vmem:[#allocation4 + $0x934] ss:$8 sps:$4 sm:$0xff]  }
 0x10a   : > { %3356 = vmatprep.subr.bf16.mxu1 %v4581_v15  ;;  %v4638_v15 = vld [vmem:[#allocation4 + $0x824] ss:$8 sps:$4 sm:$0xff]  }
 0x10b   : > { %3316 = vmatpush2.bf16.msra.mxu0 %v4576_v17  ;;  %v4636_v17 = vld [vmem:[#allocation4 + $0x820] ss:$8 sps:$4 sm:$0xff]  }
 0x10c   : > { %3317 = vmatprep.subr.bf16.mxu0 %v4584_v18  ;;  %v4641_v18 = vld [vmem:[#allocation4 + $0x924] ss:$8 sps:$4 sm:$0xff]  }
 0x10d   : > { %3357 = vmatpush2.bf16.msra.mxu1 %v4579_v19  ;;  %v4644_v19 = vld [vmem:[#allocation4 + $0x814] ss:$8 sps:$4 sm:$0xff]  }
 0x10e   : > { %3358 = vmatprep.subr.bf16.mxu1 %v4587_v20  ;;  %v4639_v20 = vld [vmem:[#allocation4 + $0x920] ss:$8 sps:$4 sm:$0xff]  }
 0x10f   : > { %3318 = vmatpush2.bf16.msra.mxu0 %v4582_v23  ;;  %v4647_v23 = vld [vmem:[#allocation4 + $0x914] ss:$8 sps:$4 sm:$0xff]  }
 0x110   : > { %3319 = vmatprep.subr.bf16.mxu0 %v4590_v24  ;;  %v4650_v24 = vld [vmem:[#allocation4 + $0x804] ss:$8 sps:$4 sm:$0xff]  }
 0x111   : > { %3359 = vmatpush2.bf16.msra.mxu1 %v4585_v25  ;;  %v4645_v25 = vld [vmem:[#allocation4 + $0x910] ss:$8 sps:$4 sm:$0xff]  }
 0x112   : > { %3360 = vmatprep.subr.bf16.mxu1 %v4593_v63  ;;  %v4648_v63 = vld [vmem:[#allocation4 + $0x800] ss:$8 sps:$4 sm:$0xff]  }
 0x113   : > { %3320 = vmatpush2.bf16.msra.mxu0 %v4588_v29  ;;  %v4651_v29 = vld [vmem:[#allocation4 + $0x900] ss:$8 sps:$4 sm:$0xff]  }
 0x114   : > { %3321 = vmatprep.subr.bf16.mxu0 %v4596_v30  ;;  %v4654_v30 = vld [vmem:[#allocation4 + $0x8f0] ss:$8 sps:$4 sm:$0xff]  }
 0x115   : > { %3361 = vmatpush2.bf16.msra.mxu1 %v4591_v33  ;;  %v4659_v33 = vld [vmem:[#allocation4 + $0x9f4] ss:$8 sps:$4 sm:$0xff]  }
 0x116   : > { %3362 = vmatprep.subr.bf16.mxu1 %v4599_v32  ;;  %v4662_v32 = vld [vmem:[#allocation4 + $0x8e4] ss:$8 sps:$4 sm:$0xff]  }
 0x117   : > { %3322 = vmatpush2.bf16.msra.mxu0 %v4594_v36  ;;  %v4665_v36 = vld [vmem:[#allocation4 + $0x9e4] ss:$8 sps:$4 sm:$0xff]  }
 0x118   : > { %3323 = vmatprep.subr.bf16.mxu0 %v4602_v41  ;;  %v4668_v41 = vld [vmem:[#allocation4 + $0x8d4] ss:$8 sps:$4 sm:$0xff]  }
 0x119   : > { %3363 = vmatpush2.bf16.msra.mxu1 %v4597_v42  ;;  %v4663_v42 = vld [vmem:[#allocation4 + $0x9e0] ss:$8 sps:$4 sm:$0xff]  }
 0x11a   : > { %3364 = vmatprep.subr.bf16.mxu1 %v4605_v43  ;;  %v4671_v43 = vld [vmem:[#allocation4 + $0x9d4] ss:$8 sps:$4 sm:$0xff]  }
 0x11b   : > { %3324 = vmatpush2.bf16.msra.mxu0 %v4600_v44  ;;  %v4674_v44 = vld [vmem:[#allocation4 + $0x8c4] ss:$8 sps:$4 sm:$0xff]  }
 0x11c   : > { %3375 = vmatprep.subr.bf16.mxu0 %v4608_v47  ;;  %v4677_v47 = vld [vmem:[#allocation4 + $0x9c4] ss:$8 sps:$4 sm:$0xff]  }
 0x11d   : > { %3365 = vmatpush2.bf16.msra.mxu1 %v4603_v49  ;;  %v4672_v49 = vld [vmem:[#allocation4 + $0x8c0] ss:$8 sps:$4 sm:$0xff]  }
 0x11e   : > { %v3081_v62 = vpop.f32.mrf.mxu0  ;;  %3326 = vmatmul.mubr.bf16.vlgmr.msra.gmra.mxu0 %v309_v50  ;;  %3416 = vmatprep.subr.bf16.mxu1 %v4611_v54  ;;  %v4680_v50 = vld [vmem:[#allocation4 + $0x8b4] ss:$8 sps:$4 sm:$0xff]  }
 0x11f   : > { %3376 = vmatpush1.bf16.msra.mxu0 %v4606_v55  ;;  %3407 = vmatprep.mubr.bf16.mxu0 %v326_v56  ;;  %v3122_v0 = vpop.f32.mrf.mxu1  ;;  %v4683_v54 = vld [vmem:[#allocation4 + $0x9b4] ss:$8 sps:$4 sm:$0xff]   ;;  %v4678_v55 = vld [vmem:[#allocation4 + $0x8b0] ss:$8 sps:$4 sm:$0xff]   ;;  %v4686_v56 = vld [vmem:[#allocation4 + $0x8a4] ss:$8 sps:$4 sm:$0xff]  }
 0x120   : > { %3367 = vmatmul.mubr.bf16.vlgmr.msra.gmra.mxu1 %v5129_v59  ;;  %v3083_v1 = vpop.f32.mrf.mxu0  ;;  %3377 = vmatprep.subr.bf16.mxu0 %v4614_v58  ;;  %v5133_v3 = vadd.f32 %v3122_v0, %v3081_v62  ;;  %v4681_v58 = vld [vmem:[#allocation4 + $0x9b0] ss:$8 sps:$4 sm:$0xff]   ;;  %v4692_v62 = vld [vmem:[#allocation4 + $0x894] ss:$8 sps:$4 sm:$0xff]   ;;  %v5138_v0 = vshll.u32 %v5129_v59, 16 }
 0x121   : > { %3417 = vmatpush1.bf16.msra.mxu1 %v4609_v60  ;;  %3448 = vmatprep.mubr.bf16.mxu1 %v332_v61  ;;  %v3124_v5 = vpop.f32.mrf.mxu1  ;;  %v4689_v60 = vld [vmem:[#allocation4 + $0x9a4] ss:$8 sps:$4 sm:$0xff]   ;;  %v4684_v61 = vld [vmem:[#allocation4 + $0x8a0] ss:$8 sps:$4 sm:$0xff]  }
 0x122   : > { %v3085_v6 = vpop.f32.mrf.mxu0  ;;  %3418 = vmatprep.subr.bf16.mxu1 %v4617_v22  ;;  %v5135_v52 = vadd.f32 %v3124_v5, %v3083_v1  ;;  %v4687_v22 = vld [vmem:[#allocation4 + $0x9a0] ss:$8 sps:$4 sm:$0xff]   ;;  %v4690_v1 = vld [vmem:[#allocation4 + $0x890] ss:$8 sps:$4 sm:$0xff]   ;;  %v4701_v5 = vld [vmem:[#allocation4 + $0x984] ss:$8 sps:$4 sm:$0xff]  }
 0x123   : > { %3378 = vmatpush1.bf16.msra.mxu0 %v4612_v37  ;;  %v3126_v7 = vpop.f32.mrf.mxu1  ;;  %v4695_v37 = vld [vmem:[#allocation4 + $0x994] ss:$8 sps:$4 sm:$0xff]   ;;  %v5141_v6 = vshrl.u32 %v5129_v59, 16 }
 0x124   : > { %v3086_v8 = vpop.f32.mrf.mxu0  ;;  %3379 = vmatprep.subr.bf16.mxu0 %v4620_v2  ;;  %v4698_v2 = vld [vmem:[#allocation4 + $0x884] ss:$8 sps:$4 sm:$0xff]   ;;  %v339_v7 = vrot.slane %v5117_v40, 2 }
 0x125   : > { %3419 = vmatpush1.bf16.msra.mxu1 %v4615_v26  ;;  %v3127_v10 = vpop.f32.mrf.mxu1  ;;  %v4693_v26 = vld [vmem:[#allocation4 + $0x990] ss:$8 sps:$4 sm:$0xff]   ;;  %v4704_v8 = vld [vmem:[#allocation4 + $0xa74] ss:$8 sps:$4 sm:$0xff]  }
 0x126   : > { %3420 = vmatprep.subr.bf16.mxu1 %v4623_v48  ;;  %v318_v48 = vrot.slane %v5138_v0, 1 }
 0x127   : > { %3380 = vmatpush1.bf16.msra.mxu0 %v4618_v51  ;;  %v4696_v51 = vld [vmem:[#allocation4 + $0x880] ss:$8 sps:$4 sm:$0xff]  }
 0x128   : > { %3381 = vmatprep.subr.bf16.mxu0 %v4626_v9  ;;  %v4699_v9 = vld [vmem:[#allocation4 + $0x980] ss:$8 sps:$4 sm:$0xff]   ;;  %v319_v10 = vor.u32 %v318_v48, %v5141_v6  ;;  %v4761_v48 = vld [vmem:[#allocation4 + $0xbe4] ss:$8 sps:$4 sm:$0xff]  }
 0x129   : > { %3421 = vmatpush1.bf16.msra.mxu1 %v4621_v57  ;;  %v338_v57 = vrot.slane %v5120_v45, 1 }
 0x12a   : > { %3422 = vmatprep.subr.bf16.mxu1 %v4629_v12  ;;  %v4702_v12 = vld [vmem:[#allocation4 + $0xa70] ss:$8 sps:$4 sm:$0xff]  }
 0x12b   : > { %3382 = vmatpush1.bf16.msra.mxu0 %v4624_v11  ;;  %v4707_v11 = vld [vmem:[#allocation4 + $0xb74] ss:$8 sps:$4 sm:$0xff]  }
 0x12c   : > { %3383 = vmatprep.subr.bf16.mxu0 %v4632_v13  ;;  %v340_v13 = vor.u32 %v339_v7, %v338_v57  ;;  %v4764_v57 = vld [vmem:[#allocation4 + $0xad4] ss:$8 sps:$4 sm:$0xff]   ;;  %v4759_v7 = vld [vmem:[#allocation4 + $0xbe0] ss:$8 sps:$4 sm:$0xff]  }
 0x12d   : > { %3423 = vmatpush1.bf16.msra.mxu1 %v4627_v38  ;;  %v331_v38 = vrot.slane %v5129_v59, 1 }
 0x12e   : > { %3424 = vmatprep.subr.bf16.mxu1 %v4635_v14  ;;  %v4705_v14 = vld [vmem:[#allocation4 + $0xb70] ss:$8 sps:$4 sm:$0xff]  }
 0x12f   : > { %3384 = vmatpush1.bf16.msra.mxu0 %v4630_v39  ;;  %v4710_v39 = vld [vmem:[#allocation4 + $0xa64] ss:$8 sps:$4 sm:$0xff]  }
 0x130   : > { %3385 = vmatprep.subr.bf16.mxu0 %v4638_v15  ;;  %v344_v15 = vrot.slane %v5108_v31, 2 }
 0x131   : > { %3425 = vmatpush1.bf16.msra.mxu1 %v4633_v16 }
 0x132   : > { %3426 = vmatprep.subr.bf16.mxu1 %v4641_v18 }
 0x133   : > { %3386 = vmatpush1.bf16.msra.mxu0 %v4636_v17  ;;  %v4713_v17 = vld [vmem:[#allocation4 + $0xb64] ss:$8 sps:$4 sm:$0xff]  }
 0x134   : > { %3387 = vmatprep.subr.bf16.mxu0 %v4644_v19  ;;  %v4708_v19 = vld [vmem:[#allocation4 + $0xa60] ss:$8 sps:$4 sm:$0xff]  }
 0x135   : > { %3427 = vmatpush1.bf16.msra.mxu1 %v4639_v20 }
 0x136   : > { %3428 = vmatprep.subr.bf16.mxu1 %v4647_v23  ;;  %v4716_v23 = vld [vmem:[#allocation4 + $0xa54] ss:$8 sps:$4 sm:$0xff]  }
 0x137   : > { %3388 = vmatpush1.bf16.msra.mxu0 %v4642_v21 }
 0x138   : > { %3389 = vmatprep.subr.bf16.mxu0 %v4650_v24 }
 0x139   : > { %3429 = vmatpush1.bf16.msra.mxu1 %v4645_v25 }
 0x13a   : > { %3430 = vmatprep.subr.bf16.mxu1 %v4653_v27 }
 0x13b   : > { %3390 = vmatpush1.bf16.msra.mxu0 %v4648_v63  ;;  %v4711_v63 = vld [vmem:[#allocation4 + $0xb60] ss:$8 sps:$4 sm:$0xff]  }
 0x13c   : > { %3391 = vmatprep.subr.bf16.mxu0 %v4656_v28 }
 0x13d   : > { %3431 = vmatpush1.bf16.msra.mxu1 %v4651_v29  ;;  %v4719_v29 = vld [vmem:[#allocation4 + $0xb54] ss:$8 sps:$4 sm:$0xff]  }
 0x13e   : > { %3432 = vmatprep.subr.bf16.mxu1 %v4659_v33 }
 0x13f   : > { %3392 = vmatpush2.bf16.msra.mxu0 %v4654_v30  ;;  %v4714_v30 = vld [vmem:[#allocation4 + $0xa50] ss:$8 sps:$4 sm:$0xff]  }
 0x140   : > { %3393 = vmatprep.subr.bf16.mxu0 %v4662_v32 }
 0x141   : > { %3433 = vmatpush2.bf16.msra.mxu1 %v4657_v34  ;;  %v4722_v34 = vld [vmem:[#allocation4 + $0xa44] ss:$8 sps:$4 sm:$0xff]  }
 0x142   : > { %3434 = vmatprep.subr.bf16.mxu1 %v4665_v36 }
 0x143   : > { %3394 = vmatpush2.bf16.msra.mxu0 %v4660_v35  ;;  %v4717_v35 = vld [vmem:[#allocation4 + $0xb50] ss:$8 sps:$4 sm:$0xff]  }
 0x144   : > { %3395 = vmatprep.subr.bf16.mxu0 %v4668_v41  ;;  %v4725_v41 = vld [vmem:[#allocation4 + $0xb44] ss:$8 sps:$4 sm:$0xff]  }
 0x145   : > { %3435 = vmatpush2.bf16.msra.mxu1 %v4663_v42  ;;  %v4728_v42 = vld [vmem:[#allocation4 + $0xa34] ss:$8 sps:$4 sm:$0xff]  }
 0x146   : > { %3436 = vmatprep.subr.bf16.mxu1 %v4671_v43  ;;  %v4723_v43 = vld [vmem:[#allocation4 + $0xb40] ss:$8 sps:$4 sm:$0xff]  }
 0x147   : > { %3396 = vmatpush2.bf16.msra.mxu0 %v4666_v4  ;;  %v4731_v4 = vld [vmem:[#allocation4 + $0xb34] ss:$8 sps:$4 sm:$0xff]  }
 0x148   : > { %3397 = vmatprep.subr.bf16.mxu0 %v4674_v44  ;;  %v4726_v44 = vld [vmem:[#allocation4 + $0xa30] ss:$8 sps:$4 sm:$0xff]  }
 0x149   : > { %3437 = vmatpush2.bf16.msra.mxu1 %v4669_v46  ;;  %v4734_v46 = vld [vmem:[#allocation4 + $0xa24] ss:$8 sps:$4 sm:$0xff]  }
 0x14a   : > { %3438 = vmatprep.subr.bf16.mxu1 %v4677_v47  ;;  %v4729_v47 = vld [vmem:[#allocation4 + $0xb30] ss:$8 sps:$4 sm:$0xff]  }
 0x14b   : > { %3398 = vmatpush2.bf16.msra.mxu0 %v4672_v49  ;;  %v4737_v49 = vld [vmem:[#allocation4 + $0xb24] ss:$8 sps:$4 sm:$0xff]  }
 0x14c   : > { %3399 = vmatprep.subr.bf16.mxu0 %v4680_v50  ;;  %v4732_v50 = vld [vmem:[#allocation4 + $0xa20] ss:$8 sps:$4 sm:$0xff]  }
 0x14d   : > { %3439 = vmatpush2.bf16.msra.mxu1 %v4675_v53  ;;  %v4740_v53 = vld [vmem:[#allocation4 + $0xa14] ss:$8 sps:$4 sm:$0xff]  }
 0x14e   : > { %3440 = vmatprep.subr.bf16.mxu1 %v4683_v54  ;;  %v4735_v54 = vld [vmem:[#allocation4 + $0xb20] ss:$8 sps:$4 sm:$0xff]  }
 0x14f   : > { %3400 = vmatpush2.bf16.msra.mxu0 %v4678_v55  ;;  %v4743_v55 = vld [vmem:[#allocation4 + $0xb14] ss:$8 sps:$4 sm:$0xff]  }
 0x150   : > { %3401 = vmatprep.subr.bf16.mxu0 %v4686_v56  ;;  %v4738_v56 = vld [vmem:[#allocation4 + $0xa10] ss:$8 sps:$4 sm:$0xff]  }
 0x151   : > { %3441 = vmatpush2.bf16.msra.mxu1 %v4681_v58  ;;  %v4746_v58 = vld [vmem:[#allocation4 + $0xa04] ss:$8 sps:$4 sm:$0xff]  }
 0x152   : > { %3442 = vmatprep.subr.bf16.mxu1 %v4689_v60  ;;  %v4741_v60 = vld [vmem:[#allocation4 + $0xb10] ss:$8 sps:$4 sm:$0xff]  }
 0x153   : > { %3402 = vmatpush2.bf16.msra.mxu0 %v4684_v61  ;;  %v4749_v61 = vld [vmem:[#allocation4 + $0xb04] ss:$8 sps:$4 sm:$0xff]  }
 0x154   : > { %3403 = vmatprep.subr.bf16.mxu0 %v4692_v62  ;;  %v4744_v62 = vld [vmem:[#allocation4 + $0xa00] ss:$8 sps:$4 sm:$0xff]  }
 0x155   : > { %3443 = vmatpush2.bf16.msra.mxu1 %v4687_v22  ;;  %v4752_v22 = vld [vmem:[#allocation4 + $0xaf4] ss:$8 sps:$4 sm:$0xff]  }
 0x156   : > { %3444 = vmatprep.subr.bf16.mxu1 %v4695_v37  ;;  %v4747_v37 = vld [vmem:[#allocation4 + $0xb00] ss:$8 sps:$4 sm:$0xff]  }
 0x157   : > { %3404 = vmatpush2.bf16.msra.mxu0 %v4690_v1  ;;  %v4755_v1 = vld [vmem:[#allocation4 + $0xbf4] ss:$8 sps:$4 sm:$0xff]  }
 0x158   : > { %3405 = vmatprep.subr.bf16.mxu0 %v4698_v2  ;;  %v4750_v2 = vld [vmem:[#allocation4 + $0xaf0] ss:$8 sps:$4 sm:$0xff]  }
 0x159   : > { %3445 = vmatpush2.bf16.msra.mxu1 %v4693_v26  ;;  %v4758_v26 = vld [vmem:[#allocation4 + $0xae4] ss:$8 sps:$4 sm:$0xff]  }
 0x15a   : > { %3446 = vmatprep.subr.bf16.mxu1 %v4701_v5  ;;  %v4753_v5 = vld [vmem:[#allocation4 + $0xbf0] ss:$8 sps:$4 sm:$0xff]  }
 0x15b   : > { %3406 = vmatpush2.bf16.msra.mxu0 %v4696_v51  ;;  %v4756_v51 = vld [vmem:[#allocation4 + $0xae0] ss:$8 sps:$4 sm:$0xff]  }
 0x15c   : > { %3457 = vmatprep.subr.bf16.mxu0 %v4704_v8  ;;  %v4767_v8 = vld [vmem:[#allocation4 + $0xbd4] ss:$8 sps:$4 sm:$0xff]  }
 0x15d   : > { %3447 = vmatpush2.bf16.msra.mxu1 %v4699_v9  ;;  %v4762_v9 = vld [vmem:[#allocation4 + $0xad0] ss:$8 sps:$4 sm:$0xff]  }
 0x15e   : > { %v3163_v16 = vpop.f32.mrf.mxu0  ;;  %3408 = vmatmul.mubr.bf16.vlgmr.msra.gmra.mxu0 %v319_v10  ;;  %3498 = vmatprep.subr.bf16.mxu1 %v4707_v11  ;;  %v4770_v10 = vld [vmem:[#allocation4 + $0xac4] ss:$8 sps:$4 sm:$0xff]   ;;  %v4765_v11 = vld [vmem:[#allocation4 + $0xbd0] ss:$8 sps:$4 sm:$0xff]  }
 0x15f   : > { %v3164_v18 = vadd.f32 %v3163_v16, %v5133_v3  ;;  %3458 = vmatpush1.bf16.msra.mxu0 %v4702_v12  ;;  %3489 = vmatprep.mubr.bf16.mxu0 %v340_v13  ;;  %v4773_v12 = vld [vmem:[#allocation4 + $0xbc4] ss:$8 sps:$4 sm:$0xff]   ;;  %v4768_v13 = vld [vmem:[#allocation4 + $0xac0] ss:$8 sps:$4 sm:$0xff]  }
 0x160   : > { %v3204_v20 = vpop.f32.mrf.mxu1  ;;  %3449 = vmatmul.mubr.bf16.vlgmr.msra.gmra.mxu1 %v331_v38  ;;  %v3165_v21 = vpop.f32.mrf.mxu0  ;;  %3459 = vmatprep.subr.bf16.mxu0 %v4710_v39  ;;  %v4776_v38 = vld [vmem:[#allocation4 + $0xab4] ss:$8 sps:$4 sm:$0xff]   ;;  %v4771_v39 = vld [vmem:[#allocation4 + $0xbc0] ss:$8 sps:$4 sm:$0xff]   ;;  %v4782_v16 = vld [vmem:[#allocation4 + $0xaa4] ss:$8 sps:$4 sm:$0xff]  }
 0x161   : > { %v5150_v24 = vadd.f32 %v3204_v20, %v3164_v18  ;;  %3499 = vmatpush1.bf16.msra.mxu1 %v4705_v14  ;;  %v3166_v25 = vadd.f32 %v3165_v21, %v5135_v52  ;;  %3530 = vmatprep.mubr.bf16.mxu1 %v344_v15  ;;  %v4720_v52 = vld [vmem:[#allocation4 + $0xa40] ss:$8 sps:$4 sm:$0xff]   ;;  %v4779_v14 = vld [vmem:[#allocation4 + $0xbb4] ss:$8 sps:$4 sm:$0xff]   ;;  %v4774_v15 = vld [vmem:[#allocation4 + $0xab0] ss:$8 sps:$4 sm:$0xff]  }
 0x162   : > { %v3206_v27 = vpop.f32.mrf.mxu1  ;;  %v3167_v28 = vpop.f32.mrf.mxu0  ;;  %3500 = vmatprep.subr.bf16.mxu1 %v4713_v17  ;;  %v4777_v17 = vld [vmem:[#allocation4 + $0xbb0] ss:$8 sps:$4 sm:$0xff]   ;;  %v4785_v18 = vld [vmem:[#allocation4 + $0xba4] ss:$8 sps:$4 sm:$0xff]   ;;  %v4788_v20 = vld [vmem:[#allocation4 + $0xa94] ss:$8 sps:$4 sm:$0xff]  }
 0x163   : > { %v5153_v3 = vadd.f32 %v3206_v27, %v3166_v25  ;;  %3460 = vmatpush1.bf16.msra.mxu0 %v4708_v19  ;;  %v4780_v19 = vld [vmem:[#allocation4 + $0xaa0] ss:$8 sps:$4 sm:$0xff]   ;;  %v4786_v25 = vld [vmem:[#allocation4 + $0xa90] ss:$8 sps:$4 sm:$0xff]   ;;  %v4797_v28 = vld [vmem:[#allocation4 + $0xb84] ss:$8 sps:$4 sm:$0xff]  }
 0x164   : > { %v3208_v33 = vpop.f32.mrf.mxu1  ;;  %v3168_v32 = vpop.f32.mrf.mxu0  ;;  %3461 = vmatprep.subr.bf16.mxu0 %v4716_v23  ;;  %v4783_v21 = vld [vmem:[#allocation4 + $0xba0] ss:$8 sps:$4 sm:$0xff]   ;;  %v4791_v23 = vld [vmem:[#allocation4 + $0xb94] ss:$8 sps:$4 sm:$0xff]   ;;  %v4789_v27 = vld [vmem:[#allocation4 + $0xb90] ss:$8 sps:$4 sm:$0xff]  }
 0x165   : > { %3501 = vmatpush1.bf16.msra.mxu1 %v4711_v63  ;;  %v4794_v63 = vld [vmem:[#allocation4 + $0xa84] ss:$8 sps:$4 sm:$0xff]   ;;  %v4792_v33 = vld [vmem:[#allocation4 + $0xa80] ss:$8 sps:$4 sm:$0xff]   ;;  %v350_v32 = vrot.slane %v5120_v45, 2  ;;  %v356_v45 = vrot.slane %v5108_v31, 3 }
 0x166   : > { %v3209_v36 = vpop.f32.mrf.mxu1  ;;  %3502 = vmatprep.subr.bf16.mxu1 %v4719_v29  ;;  %v335_v29 = vrot.slane %v5141_v6, 1  ;;  %v4807_v31 = vld [vmem:[#allocation4 + $0xd60] ss:$8 sps:$4 sm:$0xff]  }
 0x167   : > { %3462 = vmatpush1.bf16.msra.mxu0 %v4714_v30  ;;  %v336_v30 = vrot.slane %v5138_v0, 2  ;;  %v4795_v36 = vld [vmem:[#allocation4 + $0xb80] ss:$8 sps:$4 sm:$0xff]  }
 0x168   : > { %3463 = vmatprep.subr.bf16.mxu0 %v4722_v34  ;;  %v351_v34 = vrot.slane %v5117_v40, 3  ;;  %v4809_v40 = vld [vmem:[#allocation4 + $0xd64] ss:$8 sps:$4 sm:$0xff]  }
 0x169   : > { %3503 = vmatpush1.bf16.msra.mxu1 %v4717_v35  ;;  %v4800_v35 = vld [vmem:[#allocation4 + $0xc74] ss:$8 sps:$4 sm:$0xff]  }
 0x16a   : > { %3504 = vmatprep.subr.bf16.mxu1 %v4725_v41  ;;  %v337_v41 = vor.u32 %v336_v30, %v335_v29  ;;  %v4860_v29 = vld [vmem:[#allocation4 + $0xcd4] ss:$8 sps:$4 sm:$0xff]   ;;  %v4855_v30 = vld [vmem:[#allocation4 + $0xde0] ss:$8 sps:$4 sm:$0xff]  }
 0x16b   : > { %3464 = vmatpush1.bf16.msra.mxu0 %v4720_v52  ;;  %v4803_v52 = vld [vmem:[#allocation4 + $0xd74] ss:$8 sps:$4 sm:$0xff]  }
 0x16c   : > { %3465 = vmatprep.subr.bf16.mxu0 %v4728_v42  ;;  %v4798_v42 = vld [vmem:[#allocation4 + $0xc70] ss:$8 sps:$4 sm:$0xff]  }
 0x16d   : > { %3505 = vmatpush1.bf16.msra.mxu1 %v4723_v43  ;;  %v352_v43 = vor.u32 %v351_v34, %v350_v32  ;;  %v4858_v32 = vld [vmem:[#allocation4 + $0xcd0] ss:$8 sps:$4 sm:$0xff]   ;;  %v4866_v34 = vld [vmem:[#allocation4 + $0xcc4] ss:$8 sps:$4 sm:$0xff]  }
 0x16e   : > { %3506 = vmatprep.subr.bf16.mxu1 %v4731_v4  ;;  %v343_v4 = vrot.slane %v5129_v59, 2 }
 0x16f   : > { %3466 = vmatpush1.bf16.msra.mxu0 %v4726_v44  ;;  %v4806_v44 = vld [vmem:[#allocation4 + $0xc64] ss:$8 sps:$4 sm:$0xff]  }
 0x170   : > { %3467 = vmatprep.subr.bf16.mxu0 %v4734_v46  ;;  %v4801_v46 = vld [vmem:[#allocation4 + $0xd70] ss:$8 sps:$4 sm:$0xff]  }
 0x171   : > { %3507 = vmatpush1.bf16.msra.mxu1 %v4729_v47 }
 0x172   : > { %3508 = vmatprep.subr.bf16.mxu1 %v4737_v49 }
 0x173   : > { %3468 = vmatpush1.bf16.msra.mxu0 %v4732_v50  ;;  %v4804_v50 = vld [vmem:[#allocation4 + $0xc60] ss:$8 sps:$4 sm:$0xff]  }
 0x174   : > { %3469 = vmatprep.subr.bf16.mxu0 %v4740_v53 }
 0x175   : > { %3509 = vmatpush1.bf16.msra.mxu1 %v4735_v54 }
 0x176   : > { %3510 = vmatprep.subr.bf16.mxu1 %v4743_v55  ;;  %v4812_v55 = vld [vmem:[#allocation4 + $0xc54] ss:$8 sps:$4 sm:$0xff]  }
 0x177   : > { %3470 = vmatpush1.bf16.msra.mxu0 %v4738_v56 }
 0x178   : > { %3471 = vmatprep.subr.bf16.mxu0 %v4746_v58 }
 0x179   : > { %3511 = vmatpush1.bf16.msra.mxu1 %v4741_v60 }
 0x17a   : > { %3512 = vmatprep.subr.bf16.mxu1 %v4749_v61 }
 0x17b   : > { %3472 = vmatpush1.bf16.msra.mxu0 %v4744_v62  ;;  %v4815_v62 = vld [vmem:[#allocation4 + $0xd54] ss:$8 sps:$4 sm:$0xff]  }
 0x17c   : > { %3473 = vmatprep.subr.bf16.mxu0 %v4752_v22  ;;  %v4810_v22 = vld [vmem:[#allocation4 + $0xc50] ss:$8 sps:$4 sm:$0xff]  }
 0x17d   : > { %3513 = vmatpush1.bf16.msra.mxu1 %v4747_v37 }
 0x17e   : > { %3514 = vmatprep.subr.bf16.mxu1 %v4755_v1 }
 0x17f   : > { %3474 = vmatpush2.bf16.msra.mxu0 %v4750_v2  ;;  %v4818_v2 = vld [vmem:[#allocation4 + $0xc44] ss:$8 sps:$4 sm:$0xff]  }
 0x180   : > { %3475 = vmatprep.subr.bf16.mxu0 %v4758_v26  ;;  %v4813_v26 = vld [vmem:[#allocation4 + $0xd50] ss:$8 sps:$4 sm:$0xff]  }
 0x181   : > { %3515 = vmatpush2.bf16.msra.mxu1 %v4753_v5 }
 0x182   : > { %3516 = vmatprep.subr.bf16.mxu1 %v4761_v48  ;;  %v4821_v48 = vld [vmem:[#allocation4 + $0xd44] ss:$8 sps:$4 sm:$0xff]  }
 0x183   : > { %3476 = vmatpush2.bf16.msra.mxu0 %v4756_v51  ;;  %v4824_v51 = vld [vmem:[#allocation4 + $0xc34] ss:$8 sps:$4 sm:$0xff]  }
 0x184   : > { %3477 = vmatprep.subr.bf16.mxu0 %v4764_v57  ;;  %v4819_v57 = vld [vmem:[#allocation4 + $0xd40] ss:$8 sps:$4 sm:$0xff]  }
 0x185   : > { %3517 = vmatpush2.bf16.msra.mxu1 %v4759_v7  ;;  %v4827_v7 = vld [vmem:[#allocation4 + $0xd34] ss:$8 sps:$4 sm:$0xff]  }
 0x186   : > { %3518 = vmatprep.subr.bf16.mxu1 %v4767_v8  ;;  %v4822_v8 = vld [vmem:[#allocation4 + $0xc30] ss:$8 sps:$4 sm:$0xff]  }
 0x187   : > { %3478 = vmatpush2.bf16.msra.mxu0 %v4762_v9  ;;  %v4830_v9 = vld [vmem:[#allocation4 + $0xc24] ss:$8 sps:$4 sm:$0xff]  }
 0x188   : > { %3479 = vmatprep.subr.bf16.mxu0 %v4770_v10  ;;  %v4825_v10 = vld [vmem:[#allocation4 + $0xd30] ss:$8 sps:$4 sm:$0xff]  }
 0x189   : > { %3519 = vmatpush2.bf16.msra.mxu1 %v4765_v11  ;;  %v4833_v11 = vld [vmem:[#allocation4 + $0xd24] ss:$8 sps:$4 sm:$0xff]  }
 0x18a   : > { %3520 = vmatprep.subr.bf16.mxu1 %v4773_v12  ;;  %v4828_v12 = vld [vmem:[#allocation4 + $0xc20] ss:$8 sps:$4 sm:$0xff]  }
 0x18b   : > { %3480 = vmatpush2.bf16.msra.mxu0 %v4768_v13  ;;  %v4836_v13 = vld [vmem:[#allocation4 + $0xc14] ss:$8 sps:$4 sm:$0xff]  }
 0x18c   : > { %3481 = vmatprep.subr.bf16.mxu0 %v4776_v38  ;;  %v4831_v38 = vld [vmem:[#allocation4 + $0xd20] ss:$8 sps:$4 sm:$0xff]  }
 0x18d   : > { %3521 = vmatpush2.bf16.msra.mxu1 %v4771_v39  ;;  %v4839_v39 = vld [vmem:[#allocation4 + $0xd14] ss:$8 sps:$4 sm:$0xff]  }
 0x18e   : > { %3522 = vmatprep.subr.bf16.mxu1 %v4779_v14  ;;  %v4834_v14 = vld [vmem:[#allocation4 + $0xc10] ss:$8 sps:$4 sm:$0xff]  }
 0x18f   : > { %3482 = vmatpush2.bf16.msra.mxu0 %v4774_v15  ;;  %v4842_v15 = vld [vmem:[#allocation4 + $0xc04] ss:$8 sps:$4 sm:$0xff]  }
 0x190   : > { %3483 = vmatprep.subr.bf16.mxu0 %v4782_v16  ;;  %v4837_v16 = vld [vmem:[#allocation4 + $0xd10] ss:$8 sps:$4 sm:$0xff]  }
 0x191   : > { %3523 = vmatpush2.bf16.msra.mxu1 %v4777_v17  ;;  %v4845_v17 = vld [vmem:[#allocation4 + $0xd04] ss:$8 sps:$4 sm:$0xff]  }
 0x192   : > { %3524 = vmatprep.subr.bf16.mxu1 %v4785_v18  ;;  %v4840_v18 = vld [vmem:[#allocation4 + $0xc00] ss:$8 sps:$4 sm:$0xff]  }
 0x193   : > { %3484 = vmatpush2.bf16.msra.mxu0 %v4780_v19  ;;  %v4848_v19 = vld [vmem:[#allocation4 + $0xcf4] ss:$8 sps:$4 sm:$0xff]  }
 0x194   : > { %3485 = vmatprep.subr.bf16.mxu0 %v4788_v20  ;;  %v4843_v20 = vld [vmem:[#allocation4 + $0xd00] ss:$8 sps:$4 sm:$0xff]  }
 0x195   : > { %3525 = vmatpush2.bf16.msra.mxu1 %v4783_v21  ;;  %v4851_v21 = vld [vmem:[#allocation4 + $0xdf4] ss:$8 sps:$4 sm:$0xff]  }
 0x196   : > { %3526 = vmatprep.subr.bf16.mxu1 %v4791_v23  ;;  %v4846_v23 = vld [vmem:[#allocation4 + $0xcf0] ss:$8 sps:$4 sm:$0xff]  }
 0x197   : > { %3486 = vmatpush2.bf16.msra.mxu0 %v4786_v25  ;;  %v4854_v25 = vld [vmem:[#allocation4 + $0xce4] ss:$8 sps:$4 sm:$0xff]  }
 0x198   : > { %3487 = vmatprep.subr.bf16.mxu0 %v4794_v63  ;;  %v4849_v63 = vld [vmem:[#allocation4 + $0xdf0] ss:$8 sps:$4 sm:$0xff]  }
 0x199   : > { %3527 = vmatpush2.bf16.msra.mxu1 %v4789_v27  ;;  %v4857_v27 = vld [vmem:[#allocation4 + $0xde4] ss:$8 sps:$4 sm:$0xff]  }
 0x19a   : > { %3528 = vmatprep.subr.bf16.mxu1 %v4797_v28  ;;  %v4852_v28 = vld [vmem:[#allocation4 + $0xce0] ss:$8 sps:$4 sm:$0xff]  }
 0x19b   : > { %3488 = vmatpush2.bf16.msra.mxu0 %v4792_v33  ;;  %v4863_v33 = vld [vmem:[#allocation4 + $0xdd4] ss:$8 sps:$4 sm:$0xff]  }
 0x19c   : > { %3539 = vmatprep.subr.bf16.mxu0 %v4800_v35  ;;  %v4861_v35 = vld [vmem:[#allocation4 + $0xdd0] ss:$8 sps:$4 sm:$0xff]  }
 0x19d   : > { %3529 = vmatpush2.bf16.msra.mxu1 %v4795_v36  ;;  %v4869_v36 = vld [vmem:[#allocation4 + $0xdc4] ss:$8 sps:$4 sm:$0xff]  }
 0x19e   : > { %v3245_v47 = vpop.f32.mrf.mxu0  ;;  %3490 = vmatmul.mubr.bf16.vlgmr.msra.gmra.mxu0 %v337_v41  ;;  %3580 = vmatprep.subr.bf16.mxu1 %v4803_v52  ;;  %v4864_v41 = vld [vmem:[#allocation4 + $0xcc0] ss:$8 sps:$4 sm:$0xff]   ;;  %v4872_v52 = vld [vmem:[#allocation4 + $0xcb4] ss:$8 sps:$4 sm:$0xff]  }
 0x19f   : > { %v3246_v49 = vadd.f32 %v3245_v47, %v5150_v24  ;;  %3540 = vmatpush1.bf16.msra.mxu0 %v4798_v42  ;;  %3571 = vmatprep.mubr.bf16.mxu0 %v352_v43  ;;  %v4867_v42 = vld [vmem:[#allocation4 + $0xdc0] ss:$8 sps:$4 sm:$0xff]   ;;  %v4875_v43 = vld [vmem:[#allocation4 + $0xdb4] ss:$8 sps:$4 sm:$0xff]  }
 0x1a0   : > { %v3286_v53 = vpop.f32.mrf.mxu1  ;;  %3531 = vmatmul.mubr.bf16.vlgmr.msra.gmra.mxu1 %v343_v4  ;;  %v3247_v54 = vpop.f32.mrf.mxu0  ;;  %3541 = vmatprep.subr.bf16.mxu0 %v4806_v44  ;;  %v4870_v4 = vld [vmem:[#allocation4 + $0xcb0] ss:$8 sps:$4 sm:$0xff]   ;;  %v4878_v44 = vld [vmem:[#allocation4 + $0xca4] ss:$8 sps:$4 sm:$0xff]   ;;  %v4876_v47 = vld [vmem:[#allocation4 + $0xca0] ss:$8 sps:$4 sm:$0xff]  }
 0x1a1   : > { %v5162_v56 = vadd.f32 %v3286_v53, %v3246_v49  ;;  %3581 = vmatpush1.bf16.msra.mxu1 %v4801_v46  ;;  %v3248_v58 = vadd.f32 %v3247_v54, %v5153_v3  ;;  %3612 = vmatprep.mubr.bf16.mxu1 %v356_v45  ;;  %v4816_v3 = vld [vmem:[#allocation4 + $0xc40] ss:$8 sps:$4 sm:$0xff]   ;;  %v4873_v46 = vld [vmem:[#allocation4 + $0xdb0] ss:$8 sps:$4 sm:$0xff]   ;;  %v4881_v45 = vld [vmem:[#allocation4 + $0xda4] ss:$8 sps:$4 sm:$0xff]  }
 0x1a2   : > { %v3288_v60 = vpop.f32.mrf.mxu1  ;;  %v3249_v61 = vpop.f32.mrf.mxu0  ;;  %3582 = vmatprep.subr.bf16.mxu1 %v4809_v40  ;;  %v4884_v40 = vld [vmem:[#allocation4 + $0xc94] ss:$8 sps:$4 sm:$0xff]   ;;  %v4879_v49 = vld [vmem:[#allocation4 + $0xda0] ss:$8 sps:$4 sm:$0xff]   ;;  %v4882_v53 = vld [vmem:[#allocation4 + $0xc90] ss:$8 sps:$4 sm:$0xff]  }
 0x1a3   : > { %v5165_v24 = vadd.f32 %v3288_v60, %v3248_v58  ;;  %3542 = vmatpush1.bf16.msra.mxu0 %v4804_v50  ;;  %v4887_v50 = vld [vmem:[#allocation4 + $0xd94] ss:$8 sps:$4 sm:$0xff]   ;;  %v4890_v54 = vld [vmem:[#allocation4 + $0xc84] ss:$8 sps:$4 sm:$0xff]   ;;  %v348_v60 = vrot.slane %v5138_v0, 3 }
 0x1a4   : > { %v3290_v37 = vpop.f32.mrf.mxu1  ;;  %v3250_v1 = vpop.f32.mrf.mxu0  ;;  %3543 = vmatprep.subr.bf16.mxu0 %v4812_v55  ;;  %v4885_v55 = vld [vmem:[#allocation4 + $0xd90] ss:$8 sps:$4 sm:$0xff]   ;;  %v4893_v58 = vld [vmem:[#allocation4 + $0xd84] ss:$8 sps:$4 sm:$0xff]   ;;  %v4888_v61 = vld [vmem:[#allocation4 + $0xc80] ss:$8 sps:$4 sm:$0xff]  }
 0x1a5   : > { %3583 = vmatpush1.bf16.msra.mxu1 %v4807_v31  ;;  %v347_v31 = vrot.slane %v5141_v6, 2  ;;  %v355_v37 = vrot.slane %v5129_v59, 3 }
 0x1a6   : > { %v3291_v5 = vpop.f32.mrf.mxu1  ;;  %3584 = vmatprep.subr.bf16.mxu1 %v4815_v62  ;;  %v4891_v62 = vld [vmem:[#allocation4 + $0xd80] ss:$8 sps:$4 sm:$0xff]  }
 0x1a7   : > { %3544 = vmatpush1.bf16.msra.mxu0 %v4810_v22  ;;  %v349_v22 = vor.u32 %v348_v60, %v347_v31 }
 0x1a8   : > { %3545 = vmatprep.subr.bf16.mxu0 %v4818_v2 }
 0x1a9   : > { %3585 = vmatpush1.bf16.msra.mxu1 %v4813_v26 }
 0x1aa   : > { %3586 = vmatprep.subr.bf16.mxu1 %v4821_v48 }
 0x1ab   : > { %3546 = vmatpush1.bf16.msra.mxu0 %v4816_v3 }
 0x1ac   : > { %3547 = vmatprep.subr.bf16.mxu0 %v4824_v51 }
 0x1ad   : > { %3587 = vmatpush1.bf16.msra.mxu1 %v4819_v57 }
 0x1ae   : > { %3588 = vmatprep.subr.bf16.mxu1 %v4827_v7 }
 0x1af   : > { %3548 = vmatpush1.bf16.msra.mxu0 %v4822_v8 }
 0x1b0   : > { %3549 = vmatprep.subr.bf16.mxu0 %v4830_v9 }
 0x1b1   : > { %3589 = vmatpush1.bf16.msra.mxu1 %v4825_v10 }
 0x1b2   : > { %3590 = vmatprep.subr.bf16.mxu1 %v4833_v11 }
 0x1b3   : > { %3550 = vmatpush1.bf16.msra.mxu0 %v4828_v12 }
 0x1b4   : > { %3551 = vmatprep.subr.bf16.mxu0 %v4836_v13 }
 0x1b5   : > { %3591 = vmatpush1.bf16.msra.mxu1 %v4831_v38 }
 0x1b6   : > { %3592 = vmatprep.subr.bf16.mxu1 %v4839_v39 }
 0x1b7   : > { %3552 = vmatpush1.bf16.msra.mxu0 %v4834_v14 }
 0x1b8   : > { %3553 = vmatprep.subr.bf16.mxu0 %v4842_v15 }
 0x1b9   : > { %3593 = vmatpush1.bf16.msra.mxu1 %v4837_v16 }
 0x1ba   : > { %3594 = vmatprep.subr.bf16.mxu1 %v4845_v17 }
 0x1bb   : > { %3554 = vmatpush1.bf16.msra.mxu0 %v4840_v18 }
 0x1bc   : > { %3555 = vmatprep.subr.bf16.mxu0 %v4848_v19 }
 0x1bd   : > { %3595 = vmatpush1.bf16.msra.mxu1 %v4843_v20 }
 0x1be   : > { %3596 = vmatprep.subr.bf16.mxu1 %v4851_v21 }
 0x1bf   : > { %3556 = vmatpush2.bf16.msra.mxu0 %v4846_v23 }
 0x1c0   : > { %3557 = vmatprep.subr.bf16.mxu0 %v4854_v25 }
 0x1c1   : > { %3597 = vmatpush2.bf16.msra.mxu1 %v4849_v63 }
 0x1c2   : > { %3598 = vmatprep.subr.bf16.mxu1 %v4857_v27 }
 0x1c3   : > { %3558 = vmatpush2.bf16.msra.mxu0 %v4852_v28 }
 0x1c4   : > { %3559 = vmatprep.subr.bf16.mxu0 %v4860_v29 }
 0x1c5   : > { %3599 = vmatpush2.bf16.msra.mxu1 %v4855_v30 }
 0x1c6   : > { %3600 = vmatprep.subr.bf16.mxu1 %v4863_v33 }
 0x1c7   : > { %3560 = vmatpush2.bf16.msra.mxu0 %v4858_v32 }
 0x1c8   : > { %3561 = vmatprep.subr.bf16.mxu0 %v4866_v34 }
 0x1c9   : > { %3601 = vmatpush2.bf16.msra.mxu1 %v4861_v35 }
 0x1ca   : > { %3602 = vmatprep.subr.bf16.mxu1 %v4869_v36 }
 0x1cb   : > { %3562 = vmatpush2.bf16.msra.mxu0 %v4864_v41 }
 0x1cc   : > { %3563 = vmatprep.subr.bf16.mxu0 %v4872_v52 }
 0x1cd   : > { %3603 = vmatpush2.bf16.msra.mxu1 %v4867_v42 }
 0x1ce   : > { %3604 = vmatprep.subr.bf16.mxu1 %v4875_v43 }
 0x1cf   : > { %3564 = vmatpush2.bf16.msra.mxu0 %v4870_v4 }
 0x1d0   : > { %3565 = vmatprep.subr.bf16.mxu0 %v4878_v44 }
 0x1d1   : > { %3605 = vmatpush2.bf16.msra.mxu1 %v4873_v46 }
 0x1d2   : > { %3606 = vmatprep.subr.bf16.mxu1 %v4881_v45 }
 0x1d3   : > { %3566 = vmatpush2.bf16.msra.mxu0 %v4876_v47 }
 0x1d4   : > { %3567 = vmatprep.subr.bf16.mxu0 %v4884_v40 }
 0x1d5   : > { %3607 = vmatpush2.bf16.msra.mxu1 %v4879_v49 }
 0x1d6   : > { %3608 = vmatprep.subr.bf16.mxu1 %v4887_v50 }
 0x1d7   : > { %3568 = vmatpush2.bf16.msra.mxu0 %v4882_v53 }
 0x1d8   : > { %3569 = vmatprep.subr.bf16.mxu0 %v4890_v54 }
 0x1d9   : > { %3609 = vmatpush2.bf16.msra.mxu1 %v4885_v55 }
 0x1da   : > { %3610 = vmatprep.subr.bf16.mxu1 %v4893_v58 }
 0x1db   : > { %3570 = vmatpush2.bf16.msra.mxu0 %v4888_v61 }
 0x1dd   : > { %3611 = vmatpush2.bf16.msra.mxu1 %v4891_v62 }
 0x1de   : > { %v3327_v1 = vpop.f32.mrf.mxu0  ;;  %3572 = vmatmul.mubr.bf16.vlgmr.msra.gmra.mxu0 %v349_v22 }
 0x1df   : > { %v3328_v2 = vadd.f32 %v3327_v1, %v5162_v56 }
 0x1e0   : > { %v3368_v26 = vpop.f32.mrf.mxu1  ;;  %3613 = vmatmul.mubr.bf16.vlgmr.msra.gmra.mxu1 %v355_v37  ;;  %v3329_v6 = vpop.f32.mrf.mxu0 }
 0x1e1   : > { %v3369_v5 = vadd.f32 %v3368_v26, %v3328_v2  ;;  %v3330_v0 = vadd.f32 %v3329_v6, %v5165_v24 }
 0x1e2   : > { %v3370_v48 = vpop.f32.mrf.mxu1  ;;  %v3331_v3 = vpop.f32.mrf.mxu0 }
 0x1e3   : > { %v3371_v51 = vadd.f32 %v3370_v48, %v3330_v0 }
 0x1e4   : > { %v3372_v57 = vpop.f32.mrf.mxu1  ;;  %v3332_v7 = vpop.f32.mrf.mxu0 }
 0x1e6   : > { %v3373_v8 = vpop.f32.mrf.mxu1 }
 0x21e   : > { %v3409_v9 = vpop.f32.mrf.mxu0 }
 0x21f   : > { %v3410_v10 = vadd.f32 %v3409_v9, %v3369_v5 }
 0x220   : > { %v3450_v59 = vpop.f32.mrf.mxu1  ;;  %v3411_v11 = vpop.f32.mrf.mxu0 }
 0x221   : > { %v3451_v12 = vadd.f32 %v3450_v59, %v3410_v10  ;;  %v3412_v13 = vadd.f32 %v3411_v11, %v3371_v51 }
 0x222   : > { %v3452_v38 = vpop.f32.mrf.mxu1  ;;  %v3413_v56 = vpop.f32.mrf.mxu0 }
 0x223   : > { %v3453_v39 = vadd.f32 %v3452_v38, %v3412_v13 }
 0x224   : > { %v3454_v14 = vpop.f32.mrf.mxu1  ;;  %v3414_v15 = vpop.f32.mrf.mxu0 }
 0x226   : > { %v3455_v16 = vpop.f32.mrf.mxu1 }
 0x25e   : > { %v3491_v17 = vpop.f32.mrf.mxu0 }
 0x25f   : > { %v3492_v63 = vadd.f32 %v3491_v17, %v3451_v12 }
 0x260   : > { %v3532_v24 = vpop.f32.mrf.mxu1  ;;  %v3493_v18 = vpop.f32.mrf.mxu0 }
 0x261   : > { %v3494_v27 = vadd.f32 %v3493_v18, %v3453_v39  ;;  %v3533_v28 = vadd.f32 %v3532_v24, %v3492_v63 }
 0x262   : > { %v3534_v19 = vpop.f32.mrf.mxu1  ;;  %v3495_v20 = vpop.f32.mrf.mxu0 }
 0x263   : > { %v3535_v30 = vadd.f32 %v3534_v19, %v3494_v27 }
 0x264   : > { %v3536_v21 = vpop.f32.mrf.mxu1  ;;  %v3496_v23 = vpop.f32.mrf.mxu0 }
 0x266   : > { %v3537_v25 = vpop.f32.mrf.mxu1 }
 0x29e   : > { %v3573_v29 = vpop.f32.mrf.mxu0 }
 0x29f   : > { %v3574_v33 = vadd.f32 %v3573_v29, %v3533_v28 }
 0x2a0   : > { %v3614_v32 = vpop.f32.mrf.mxu1  ;;  %v3575_v34 = vpop.f32.mrf.mxu0 }
 0x2a1   : > { %v3615_v35 = vadd.f32 %v3614_v32, %v3574_v33  ;;  %v3576_v36 = vadd.f32 %v3575_v34, %v3535_v30 }
 0x2a2   : > { %v3616_v41 = vpop.f32.mrf.mxu1  ;;  %v3577_v52 = vpop.f32.mrf.mxu0 }
 0x2a3   : > { %v4179_v42 = vmul.f32 -1.442695, %v3615_v35  ;;  %v3617_v43 = vadd.f32 %v3616_v41, %v3576_v36 }
 0x2a4   : > { %v3618_v4 = vpop.f32.mrf.mxu1  ;;  %v3578_v44 = vpop.f32.mrf.mxu0 }
 0x2a5   : > { %4894 = vpow2.f32 %v4179_v42  ;;  %v4180_v46 = vmul.f32 -1.442695, %v3617_v43 }
 0x2a6   : > { %v3619_v45 = vpop.f32.mrf.mxu1 }
 0x2a7   : > { %4896 = vpow2.f32 %v4180_v46 }
 0x2b2   : > { %v4895_v47 = vpop.eup %4894 }
 0x2b3   : > { %v3627_v40 = vadd.f32 1.0, %v4895_v47 }
 0x2b4   : > { %v4897_v49 = vpop.eup %4896 }
 0x2b5   : > { %4898 = vrcp.f32 %v3627_v40  ;;  %v3628_v50 = vadd.f32 1.0, %v4897_v49 }
 0x2b7   : > { %4900 = vrcp.f32 %v3628_v50 }
 0x2c2   : > { %v4899_v53 = vpop.eup %4898 }
 0x2c3   : > { %3633 = vst [vmem:[%s189_s30] sm:$0xff] %v4899_v53 }
 0x2c4   : > { %v4901_v54 = vpop.eup %4900 }
 0x2c5   : > { %3634 = vst [vmem:[%s189_s30 + $0x8] sm:$0xff] %v4901_v54 }
 0x2c6 PF: > { %s13_s11 = sadd.s32 1, %s4958_s11   ;;  %s5194_s9 = smov %s4954_s10 }
 0x2c7   : > { %p10_p2 = scmp.ge.s32.totalorder %s13_s11, 4   ;;  %s5195_s10 = smov %s5197_s13 }
 0x2c9   :  { %12 = sbr.rel (!%p10_p2) target bundleno = 2 (0x2), region = 63 }
 0x2ce   :  { %3656 = vsyncpa [#allocation5], 1 }
 0x2cf   :  { %3658 = vsyncpa [#allocation5 + $0x1], 1 }

</bundles_post_ra>
